<compile_context>
chip_gen: v7x
topology: tpu7x:2x2x1
jax: 0.10.0
libtpu: 0.0.40
codegen_flags: <defaults>
</compile_context>

<pallas_src>
import functools

import numpy as np
import jax
import jax.numpy as jnp
from jax.experimental import pallas as pl
from jax.experimental.pallas import tpu as pltpu


# --------------------------------------------------------------------------
# Pallas kernel: fused nearest-2x upsample + 3x3 conv (pad 1) + bias
# --------------------------------------------------------------------------
# Output phase (a, c) = (y % 2, x % 2).  For y = 2i + a, x = 2j + c the 3x3 conv
# on the nearest-2x upsampled image only reads a 2x2 neighbourhood of the
# original (1-px zero-padded) map:
#   row taps (phase a): r=0 -> X_pad[i + a + 0],  r=1 -> X_pad[i + a + 1]
#   col taps (phase c): s=0 -> X_pad[j + c + 0],  s=1 -> X_pad[j + c + 1]
# with phase-summed 3x3 weights (see prepare_upsample_conv_params).

def _upsample_conv_kernel(x_ref, w_ref, b_ref, o_ref, xpad_ref, lhs_ref,
                          *, H, W, C, CP):
    # x_ref   : (Bt, H, W, C)        unpadded channels-last input tile (f32)
    # w_ref   : (1, 2, 4*CP, CP)     K-stacked weights for this row phase (bf16)
    # b_ref   : (1, CP)              bias, lane-padded (f32)
    # o_ref   : (Bt, 1, 2, H*W, CP)  phase-major output (row phase a, col phase c)
    # xpad_ref: (Bt, H+2, W+2, CP)   f32 scratch: spatial + channel zero pad
    # lhs_ref : (Bt*H*W, 6*CP)       bf16 scratch: K-stacked im2col (6 windows)
    a = pl.program_id(1)                       # output row phase in {0, 1}
    Bt = x_ref.shape[0]
    M = Bt * H * W

    # 1) zero-pad (1 px spatial) + channel pad (C -> CP) into VMEM scratch.
    xpad_ref[...] = jnp.zeros_like(xpad_ref)
    xpad_ref[:, 1:H + 1, 1:W + 1, :C] = x_ref[...]

    # 2) K-stacked im2col: the 6 distinct shifted windows (col offset dx in
    #    {0,1,2}, row tap r in {0,1}) are copied ONCE each into an aligned,
    #    contiguous bf16 scratch at column block u = 2*dx + r.
    for dx in range(3):
        for r in range(2):
            u = 2 * dx + r
            win = xpad_ref[:, pl.ds(a + r, H), dx:dx + W, :]
            lhs_ref[:, u * CP:(u + 1) * CP] = (
                win.reshape(M, CP).astype(lhs_ref.dtype))

    # 3) one K = 4*CP bf16 matmul per column phase (overlapping, aligned
    #    K-slices of the scratch), f32 MXU accumulation, bias add, lane-dense
    #    store into the phase-major output block.
    bias = b_ref[...]                                          # (1, CP) f32
    for c in range(2):
        lhs = lhs_ref[:, 2 * c * CP:(2 * c + 4) * CP]          # (M, 4*CP) bf16
        acc = jnp.dot(lhs, w_ref[0, c],
                      preferred_element_type=jnp.float32)      # (M, CP) f32
        o_ref[:, 0, c, :, :] = (acc + bias).reshape(
            Bt, H * W, CP).astype(o_ref.dtype)


def _pick_batch_tile(B, H, W, CP):
    """Largest divisor of B giving >=128 matmul rows (when possible) while
    keeping the per-step im2col scratch modest."""
    bt = 1
    for d in range(1, B + 1):
        if B % d:
            continue
        if d * H * W * 6 * CP * 2 > (4 << 20):    # bf16 im2col scratch bytes
            break
        bt = d
        if d * H * W >= 256:
            break
    return bt


def _fused_upsample_conv(x_nchw, w_eff, b_pad):
    """x_nchw: (B, C, H, W) f32 -> (B, C, 2H, 2W) f32."""
    B, C, H, W = x_nchw.shape
    CP = w_eff.shape[-1]
    Bt = _pick_batch_tile(B, H, W, CP)

    # Only unavoidable input layout op for an NCHW module interface.
    x = jnp.transpose(x_nchw, (0, 2, 3, 1))              # channels on lanes

    # TODO(synk): for real VQGAN shapes (H,W >= 64, C >= 256) add an H-tile grid
    # axis with a 2-row halo so per-step VMEM stays inside v7x's 64 MiB / v5e's
    # 16 MiB default scoped limit.
    out = pl.pallas_call(
        functools.partial(_upsample_conv_kernel, H=H, W=W, C=C, CP=CP),
        out_shape=jax.ShapeDtypeStruct((B, 2, 2, H * W, CP), x_nchw.dtype),
        grid=(B // Bt, 2),                                # (batch tiles, row phase)
        in_specs=[
            pl.BlockSpec((Bt, H, W, C), lambda i, a: (i, 0, 0, 0)),
            pl.BlockSpec((1, 2, 4 * CP, CP), lambda i, a: (a, 0, 0, 0)),
            pl.BlockSpec((1, CP), lambda i, a: (0, 0)),
        ],
        out_specs=pl.BlockSpec((Bt, 1, 2, H * W, CP),
                               lambda i, a: (i, a, 0, 0, 0)),
        scratch_shapes=[
            pltpu.VMEM((Bt, H + 2, W + 2, CP), jnp.float32),   # padded activations
            pltpu.VMEM((Bt * H * W, 6 * CP), jnp.bfloat16),    # K-stacked im2col
        ],
        compiler_params=pltpu.CompilerParams(
            dimension_semantics=("parallel", "parallel")),     # v7x: 2 TCs busy
    )(x, w_eff, b_pad)

    # Phase-major -> NCHW: the 2x2 phase interleave is folded into the ONE output
    # transpose; the reshapes are contiguous merges (free), the lane crop fuses.
    out = out.reshape(B, 2, 2, H, W, CP)[..., :C]
    out = jnp.transpose(out, (0, 5, 3, 1, 4, 2)).reshape(B, C, 2 * H, 2 * W)
    return out


def upsample_forward(x, w_eff=None, b_pad=None, with_conv=True):
    """Forward of the PyTorch `Upsample` module (NCHW in / NCHW out)."""
    if not with_conv:
        # Pure data movement (nearest 2x repeat): no arithmetic to fuse, XLA
        # emits a single copy for this, so a Pallas kernel would add nothing.
        return jnp.repeat(jnp.repeat(x, 2, axis=2), 2, axis=3)
    return _fused_upsample_conv(x, w_eff, b_pad)


# --------------------------------------------------------------------------
# One-time weight layout prep (run OUTSIDE the jitted forward)
# --------------------------------------------------------------------------

# phase/tap -> contributing rows (resp. cols) of the 3x3 kernel
_TAPS = (((0,), (1, 2)),      # phase 0: tap 0 -> k{0},      tap 1 -> k{1}+k{2}
         ((0, 1), (2,)))      # phase 1: tap 0 -> k{0}+k{1}, tap 1 -> k{2}


def prepare_upsample_conv_params(w, b, lane=128):
    """w: torch layout (Cout, Cin, 3, 3), b: (Cout,).
    Returns (w_eff (2, 2, 4*CP, CP) bf16, b_pad (1, CP) f32), CP = pad-to-128.
    Taps are stacked along K in order t = 2*s + r to match the kernel's im2col."""
    Cout, Cin, KH, KW = w.shape
    assert (KH, KW) == (3, 3)
    CP = ((max(Cin, Cout) + lane - 1) // lane) * lane
    wt = jnp.transpose(jnp.asarray(w, jnp.float32), (2, 3, 1, 0))   # (3,3,Cin,Cout)
    wt = jnp.pad(wt, ((0, 0), (0, 0), (0, CP - Cin), (0, CP - Cout)))
    phases = []
    for a in range(2):
        row = []
        for c in range(2):
            taps = []
            for s in range(2):              # K-block order t = 2*s + r
                for r in range(2):
                    acc = jnp.zeros((CP, CP), jnp.float32)
                    for ky in _TAPS[a][r]:
                        for kx in _TAPS[c][s]:
                            acc = acc + wt[ky, kx]
                    taps.append(acc)
            row.append(jnp.concatenate(taps, axis=0))               # (4*CP, CP)
        phases.append(jnp.stack(row))                               # (2, 4*CP, CP)
    w_eff = jnp.stack(phases).astype(jnp.bfloat16)                  # (2,2,4*CP,CP)
    b_pad = jnp.pad(jnp.asarray(b, jnp.float32), (0, CP - Cout)).reshape(1, CP)
    return w_eff, b_pad


# --------------------------------------------------------------------------
# main
# --------------------------------------------------------------------------

if __name__ == "__main__":
    key = jax.random.PRNGKey(0)
    kx, kw, kb = jax.random.split(key, 3)

    B, C, H, W = 2, 64, 8, 8
    x = jax.random.normal(kx, (B, C, H, W), jnp.float32)
    w = jax.random.normal(kw, (C, C, 3, 3), jnp.float32) / np.sqrt(C * 9)
    b = 0.1 * jax.random.normal(kb, (C,), jnp.float32)

    # one-time weight/bias layout prep, outside the jitted forward
    w_eff, b_pad = prepare_upsample_conv_params(w, b)

    fwd = jax.jit(upsample_forward)                     # with_conv=True path
    out = jax.block_until_ready(fwd(x, w_eff, b_pad))
    assert out.shape == (B, C, 2 * H, 2 * W), out.shape

    # with_conv=False branch of the module (plain data movement)
    up_only = upsample_forward(x, with_conv=False)
    assert up_only.shape == (B, C, 2 * H, 2 * W)

    # pure-JAX f32 reference: nearest-2x + 3x3 conv (pad 1) + bias
    u = jnp.repeat(jnp.repeat(x, 2, axis=2), 2, axis=3)
    ref = jax.lax.conv_general_dilated(
        u, w, (1, 1), ((1, 1), (1, 1)),
        dimension_numbers=("NCHW", "OIHW", "NCHW")) + b[None, :, None, None]

    assert bool(jnp.all(jnp.isfinite(out)))
    err = float(jnp.max(jnp.abs(out - ref)))
    # bf16 MXU operands + f32 accumulation: ~1e-3-level abs error vs f32 reference
    assert jnp.allclose(out, ref, atol=2e-2, rtol=2e-2), err
    print("KERNEL_OK")
</pallas_src>

<mosaic_0001>
module attributes {stable_mosaic.version = 11 : i64} {
  func.func @_upsample_conv_kernel(%arg0: i32, %arg1: i32, %arg2: memref<2x8x8x64xf32, #tpu.memory_space<vmem>>, %arg3: memref<1x2x512x128xbf16, #tpu.memory_space<vmem>>, %arg4: memref<1x128xf32, #tpu.memory_space<vmem>>, %arg5: memref<2x1x2x64x128xf32, #tpu.memory_space<vmem>>, %arg6: memref<2x10x10x128xf32, #tpu.memory_space<vmem>>, %arg7: memref<128x768xbf16, #tpu.memory_space<vmem>>) attributes {dimension_semantics = [#tpu.dimension_semantics<parallel>, #tpu.dimension_semantics<parallel>], iteration_bounds = array<i64: 1, 2>, scalar_prefetch = 0 : i64, scratch_operands = 2 : i64, tpu.core_type = #tpu.core_type<tc>, window_params = [{transform_indices = @transform_0, window_bounds = array<i64: 2, 8, 8, 64>}, {transform_indices = @transform_1, window_bounds = array<i64: 1, 2, 512, 128>}, {pipeline_mode = #tpu.pipeline_mode<synchronous>, transform_indices = @transform_2, window_bounds = array<i64: 1, 128>}, {transform_indices = @transform_3, window_bounds = array<i64: 2, 1, 2, 64, 128>}]} {
    %cst = arith.constant 0.000000e+00 : f32
    %0 = vector.broadcast %cst : f32 to vector<2x10x10x128xf32>
    %c0 = arith.constant 0 : index
    %c0_0 = arith.constant 0 : index
    %c0_1 = arith.constant 0 : index
    %c0_2 = arith.constant 0 : index
    %1 = vector.load %arg6[%c0, %c0_0, %c0_1, %c0_2] : memref<2x10x10x128xf32, #tpu.memory_space<vmem>>, vector<2x10x10x128xf32>
    tpu.vector_store %arg6[%c0, %c0_0, %c0_1, %c0_2], %0 {strides = array<i32>} : memref<2x10x10x128xf32, #tpu.memory_space<vmem>>, vector<2x10x10x128xf32>,
    %c0_3 = arith.constant 0 : index
    %c0_4 = arith.constant 0 : index
    %c0_5 = arith.constant 0 : index
    %c0_6 = arith.constant 0 : index
    %2 = vector.load %arg2[%c0_3, %c0_4, %c0_5, %c0_6] : memref<2x8x8x64xf32, #tpu.memory_space<vmem>>, vector<2x8x8x64xf32>
    %c0_7 = arith.constant 0 : index
    %c1 = arith.constant 1 : index
    %c1_8 = arith.constant 1 : index
    %c0_9 = arith.constant 0 : index
    %3 = vector.load %arg6[%c0_7, %c1, %c1_8, %c0_9] : memref<2x10x10x128xf32, #tpu.memory_space<vmem>>, vector<2x8x8x64xf32>
    tpu.vector_store %arg6[%c0_7, %c1, %c1_8, %c0_9], %2 {strides = array<i32>} : memref<2x10x10x128xf32, #tpu.memory_space<vmem>>, vector<2x8x8x64xf32>,
    %c0_i32 = arith.constant 0 : i32
    %4 = arith.addi %arg1, %c0_i32 : i32
    %c0_10 = arith.constant 0 : index
    %5 = arith.index_cast %4 : i32 to index
    %c0_11 = arith.constant 0 : index
    %c0_12 = arith.constant 0 : index
    %6 = vector.load %arg6[%c0_10, %5, %c0_11, %c0_12] : memref<2x10x10x128xf32, #tpu.memory_space<vmem>>, vector<2x8x8x128xf32>
    %7 = vector.shape_cast %6 : vector<2x8x8x128xf32> to vector<128x128xf32>
    %8 = arith.truncf %7 : vector<128x128xf32> to vector<128x128xbf16>
    %c0_13 = arith.constant 0 : index
    %c0_14 = arith.constant 0 : index
    %9 = vector.load %arg7[%c0_13, %c0_14] : memref<128x768xbf16, #tpu.memory_space<vmem>>, vector<128x128xbf16>
    tpu.vector_store %arg7[%c0_13, %c0_14], %8 {strides = array<i32>} : memref<128x768xbf16, #tpu.memory_space<vmem>>, vector<128x128xbf16>,
    %c1_i32 = arith.constant 1 : i32
    %10 = arith.addi %arg1, %c1_i32 : i32
    %c0_15 = arith.constant 0 : index
    %11 = arith.index_cast %10 : i32 to index
    %c0_16 = arith.constant 0 : index
    %c0_17 = arith.constant 0 : index
    %12 = vector.load %arg6[%c0_15, %11, %c0_16, %c0_17] : memref<2x10x10x128xf32, #tpu.memory_space<vmem>>, vector<2x8x8x128xf32>
    %13 = vector.shape_cast %12 : vector<2x8x8x128xf32> to vector<128x128xf32>
    %14 = arith.truncf %13 : vector<128x128xf32> to vector<128x128xbf16>
    %c0_18 = arith.constant 0 : index
    %c128 = arith.constant 128 : index
    %15 = vector.load %arg7[%c0_18, %c128] : memref<128x768xbf16, #tpu.memory_space<vmem>>, vector<128x128xbf16>
    tpu.vector_store %arg7[%c0_18, %c128], %14 {strides = array<i32>} : memref<128x768xbf16, #tpu.memory_space<vmem>>, vector<128x128xbf16>,
    %c0_i32_19 = arith.constant 0 : i32
    %16 = arith.addi %arg1, %c0_i32_19 : i32
    %c0_20 = arith.constant 0 : index
    %17 = arith.index_cast %16 : i32 to index
    %c1_21 = arith.constant 1 : index
    %c0_22 = arith.constant 0 : index
    %18 = vector.load %arg6[%c0_20, %17, %c1_21, %c0_22] : memref<2x10x10x128xf32, #tpu.memory_space<vmem>>, vector<2x8x8x128xf32>
    %19 = vector.shape_cast %18 : vector<2x8x8x128xf32> to vector<128x128xf32>
    %20 = arith.truncf %19 : vector<128x128xf32> to vector<128x128xbf16>
    %c0_23 = arith.constant 0 : index
    %c256 = arith.constant 256 : index
    %21 = vector.load %arg7[%c0_23, %c256] : memref<128x768xbf16, #tpu.memory_space<vmem>>, vector<128x128xbf16>
    tpu.vector_store %arg7[%c0_23, %c256], %20 {strides = array<i32>} : memref<128x768xbf16, #tpu.memory_space<vmem>>, vector<128x128xbf16>,
    %c1_i32_24 = arith.constant 1 : i32
    %22 = arith.addi %arg1, %c1_i32_24 : i32
    %c0_25 = arith.constant 0 : index
    %23 = arith.index_cast %22 : i32 to index
    %c1_26 = arith.constant 1 : index
    %c0_27 = arith.constant 0 : index
    %24 = vector.load %arg6[%c0_25, %23, %c1_26, %c0_27] : memref<2x10x10x128xf32, #tpu.memory_space<vmem>>, vector<2x8x8x128xf32>
    %25 = vector.shape_cast %24 : vector<2x8x8x128xf32> to vector<128x128xf32>
    %26 = arith.truncf %25 : vector<128x128xf32> to vector<128x128xbf16>
    %c0_28 = arith.constant 0 : index
    %c384 = arith.constant 384 : index
    %27 = vector.load %arg7[%c0_28, %c384] : memref<128x768xbf16, #tpu.memory_space<vmem>>, vector<128x128xbf16>
    tpu.vector_store %arg7[%c0_28, %c384], %26 {strides = array<i32>} : memref<128x768xbf16, #tpu.memory_space<vmem>>, vector<128x128xbf16>,
    %c0_i32_29 = arith.constant 0 : i32
    %28 = arith.addi %arg1, %c0_i32_29 : i32
    %c0_30 = arith.constant 0 : index
    %29 = arith.index_cast %28 : i32 to index
    %c2 = arith.constant 2 : index
    %c0_31 = arith.constant 0 : index
    %30 = vector.load %arg6[%c0_30, %29, %c2, %c0_31] : memref<2x10x10x128xf32, #tpu.memory_space<vmem>>, vector<2x8x8x128xf32>
    %31 = vector.shape_cast %30 : vector<2x8x8x128xf32> to vector<128x128xf32>
    %32 = arith.truncf %31 : vector<128x128xf32> to vector<128x128xbf16>
    %c0_32 = arith.constant 0 : index
    %c512 = arith.constant 512 : index
    %33 = vector.load %arg7[%c0_32, %c512] : memref<128x768xbf16, #tpu.memory_space<vmem>>, vector<128x128xbf16>
    tpu.vector_store %arg7[%c0_32, %c512], %32 {strides = array<i32>} : memref<128x768xbf16, #tpu.memory_space<vmem>>, vector<128x128xbf16>,
    %c1_i32_33 = arith.constant 1 : i32
    %34 = arith.addi %arg1, %c1_i32_33 : i32
    %c0_34 = arith.constant 0 : index
    %35 = arith.index_cast %34 : i32 to index
    %c2_35 = arith.constant 2 : index
    %c0_36 = arith.constant 0 : index
    %36 = vector.load %arg6[%c0_34, %35, %c2_35, %c0_36] : memref<2x10x10x128xf32, #tpu.memory_space<vmem>>, vector<2x8x8x128xf32>
    %37 = vector.shape_cast %36 : vector<2x8x8x128xf32> to vector<128x128xf32>
    %38 = arith.truncf %37 : vector<128x128xf32> to vector<128x128xbf16>
    %c0_37 = arith.constant 0 : index
    %c640 = arith.constant 640 : index
    %39 = vector.load %arg7[%c0_37, %c640] : memref<128x768xbf16, #tpu.memory_space<vmem>>, vector<128x128xbf16>
    tpu.vector_store %arg7[%c0_37, %c640], %38 {strides = array<i32>} : memref<128x768xbf16, #tpu.memory_space<vmem>>, vector<128x128xbf16>,
    %c0_38 = arith.constant 0 : index
    %c0_39 = arith.constant 0 : index
    %40 = vector.load %arg4[%c0_38, %c0_39] : memref<1x128xf32, #tpu.memory_space<vmem>>, vector<1x128xf32>
    %c0_40 = arith.constant 0 : index
    %c0_41 = arith.constant 0 : index
    %41 = vector.load %arg7[%c0_40, %c0_41] : memref<128x768xbf16, #tpu.memory_space<vmem>>, vector<128x512xbf16>
    %c0_42 = arith.constant 0 : index
    %c0_43 = arith.constant 0 : index
    %c0_44 = arith.constant 0 : index
    %c0_45 = arith.constant 0 : index
    %42 = vector.load %arg3[%c0_42, %c0_43, %c0_44, %c0_45] : memref<1x2x512x128xbf16, #tpu.memory_space<vmem>>, vector<1x1x512x128xbf16>
    %43 = vector.shape_cast %42 : vector<1x1x512x128xbf16> to vector<512x128xbf16>
    %cst_46 = arith.constant dense<0.000000e+00> : vector<128x128xf32>
    %44 = tpu.matmul %41, %43, %cst_46 {dimension_numbers = #tpu.dot_dimension_numbers<[1], [0], [0], [1], [0, 0, 1, 1], [], []>} : vector<128x512xbf16>, vector<512x128xbf16>, vector<128x128xf32> -> vector<128x128xf32>
    %45 = vector.broadcast %40 : vector<1x128xf32> to vector<128x128xf32>
    %46 = arith.addf %44, %45 : vector<128x128xf32>
    %47 = vector.shape_cast %46 : vector<128x128xf32> to vector<2x64x128xf32>
    %c0_47 = arith.constant 0 : index
    %c0_48 = arith.constant 0 : index
    %c0_49 = arith.constant 0 : index
    %c0_50 = arith.constant 0 : index
    %c0_51 = arith.constant 0 : index
    %48 = vector.load %arg5[%c0_47, %c0_48, %c0_49, %c0_50, %c0_51] : memref<2x1x2x64x128xf32, #tpu.memory_space<vmem>>, vector<2x1x1x64x128xf32>
    %49 = vector.shape_cast %48 : vector<2x1x1x64x128xf32> to vector<2x64x128xf32>
    %50 = vector.shape_cast %47 : vector<2x64x128xf32> to vector<2x1x1x64x128xf32>
    tpu.vector_store %arg5[%c0_47, %c0_48, %c0_49, %c0_50, %c0_51], %50 {strides = array<i32>} : memref<2x1x2x64x128xf32, #tpu.memory_space<vmem>>, vector<2x1x1x64x128xf32>,
    %c0_52 = arith.constant 0 : index
    %c256_53 = arith.constant 256 : index
    %51 = vector.load %arg7[%c0_52, %c256_53] : memref<128x768xbf16, #tpu.memory_space<vmem>>, vector<128x512xbf16>
    %c0_54 = arith.constant 0 : index
    %c1_55 = arith.constant 1 : index
    %c0_56 = arith.constant 0 : index
    %c0_57 = arith.constant 0 : index
    %52 = vector.load %arg3[%c0_54, %c1_55, %c0_56, %c0_57] : memref<1x2x512x128xbf16, #tpu.memory_space<vmem>>, vector<1x1x512x128xbf16>
    %53 = vector.shape_cast %52 : vector<1x1x512x128xbf16> to vector<512x128xbf16>
    %cst_58 = arith.constant dense<0.000000e+00> : vector<128x128xf32>
    %54 = tpu.matmul %51, %53, %cst_58 {dimension_numbers = #tpu.dot_dimension_numbers<[1], [0], [0], [1], [0, 0, 1, 1], [], []>} : vector<128x512xbf16>, vector<512x128xbf16>, vector<128x128xf32> -> vector<128x128xf32>
    %55 = vector.broadcast %40 : vector<1x128xf32> to vector<128x128xf32>
    %56 = arith.addf %54, %55 : vector<128x128xf32>
    %57 = vector.shape_cast %56 : vector<128x128xf32> to vector<2x64x128xf32>
    %c0_59 = arith.constant 0 : index
    %c0_60 = arith.constant 0 : index
    %c1_61 = arith.constant 1 : index
    %c0_62 = arith.constant 0 : index
    %c0_63 = arith.constant 0 : index
    %58 = vector.load %arg5[%c0_59, %c0_60, %c1_61, %c0_62, %c0_63] : memref<2x1x2x64x128xf32, #tpu.memory_space<vmem>>, vector<2x1x1x64x128xf32>
    %59 = vector.shape_cast %58 : vector<2x1x1x64x128xf32> to vector<2x64x128xf32>
    %60 = vector.shape_cast %57 : vector<2x64x128xf32> to vector<2x1x1x64x128xf32>
    tpu.vector_store %arg5[%c0_59, %c0_60, %c1_61, %c0_62, %c0_63], %60 {strides = array<i32>} : memref<2x1x2x64x128xf32, #tpu.memory_space<vmem>>, vector<2x1x1x64x128xf32>,
    return
  }
  func.func @transform_0(%arg0: i32, %arg1: i32) -> (i32, i32, i32, i32) {
    %c0_i32 = arith.constant 0 : i32
    %c0_i32_0 = arith.constant 0 : i32
    %c0_i32_1 = arith.constant 0 : i32
    %c0_i32_2 = arith.constant 0 : i32
    return %arg0, %c0_i32, %c0_i32_0, %c0_i32_1 : i32, i32, i32, i32
  }
  func.func @transform_1(%arg0: i32, %arg1: i32) -> (i32, i32, i32, i32) {
    %c0_i32 = arith.constant 0 : i32
    %c0_i32_0 = arith.constant 0 : i32
    %c0_i32_1 = arith.constant 0 : i32
    %c0_i32_2 = arith.constant 0 : i32
    return %arg1, %c0_i32, %c0_i32_0, %c0_i32_1 : i32, i32, i32, i32
  }
  func.func @transform_2(%arg0: i32, %arg1: i32) -> (i32, i32) {
    %c0_i32 = arith.constant 0 : i32
    %c0_i32_0 = arith.constant 0 : i32
    %c0_i32_1 = arith.constant 0 : i32
    return %c0_i32, %c0_i32_0 : i32, i32
  }
  func.func @transform_3(%arg0: i32, %arg1: i32) -> (i32, i32, i32, i32, i32) {
    %c0_i32 = arith.constant 0 : i32
    %c0_i32_0 = arith.constant 0 : i32
    %c0_i32_1 = arith.constant 0 : i32
    %c0_i32_2 = arith.constant 0 : i32
    return %arg0, %arg1, %c0_i32, %c0_i32_0, %c0_i32_1 : i32, i32, i32, i32, i32
  }
}

</mosaic_0001>

<bundles_post_ra>
// kernel: upsample_forward.1
= control target key start
LH: loop header
LB: loop body
LE: loop exit
PB: predicated region body
PF: predicated region fallthrough
CT: control target
= control target key end

     0   :  { %8 = vsyncpa [#allocation5], 0  ;;  %s3033_s0 = inlined_call_operand.hbm [shape: f32[2,8,8,64], index: 0, kind: input, shape index: {}]   ;;  %s3034_s1 = inlined_call_operand.hbm [shape: bf16[2,2,512,128], index: 1, kind: input, shape index: {}]   ;;  %s3035_s2 = inlined_call_operand.vmem [shape: f32[1,128], index: 2, kind: input, shape index: {}]   ;;  %s3036_s3 = inlined_call_operand.vmem [shape: f32[2,2,2,64,128], index: 3, kind: output, shape index: {}]  }
   0x1   :  { %9 = vsyncpa [#allocation7], 0 }
   0x2   :  { %11 = vsyncpa [#allocation7 + $0x1], 0  ;;  %s2509_s12 = smov 0   ;;  %s2511_s13 = smov 0  }
   0x3   :  { %s2513_s14 = smov 0   ;;  %s2515_s15 = smov 0  }
   0x4   :  { %s2517_s16 = smov 0   ;;  %s2519_s17 = smov 0  }
   0x5 LB: > { %s1763_s18 = sadd.s32 4294967295, %s2480_s17   ;;  %p75_p0 = scmp.ne.s32.totalorder %s2464_s13, %s2460_s12  ;;  %s2480_s17 = sphi %s2519_s17, %s17_s17   ;;  %s2476_s16 = sphi %s2517_s16, %s3056_s16   ;;  %s2472_s15 = sphi %s2515_s15, %s3055_s15   ;;  %s2468_s14 = sphi %s2513_s14, %s3054_s14   ;;  %s2464_s13 = sphi %s2511_s13, %s3053_s13   ;;  %s2460_s12 = sphi %s2509_s12, %s3052_s12  }
   0x6   : > { %p2539_p1 = scmp.eq.s32.totalorder %s1763_s18, 0  ;;  %p2543_p2 = scmp.eq.s32.totalorder %s1763_s18, 1 }
   0x7   : > { %p1765_p3 = scmp.ge.s32.totalorder %s2480_s17, 1  ;;  %p135_p4 = scmp.lt.s32.totalorder %s2480_s17, 3 }
   0x8   : > { %s3041_s19 = scalar_select %p2539_p1, 1, 0 }
   0x9   : > { %s3042_s20 = scalar_select %p2543_p2, 1, 0 }
   0xa   : > { %p2551_p5 = por %p2539_p1, %p75_p0  ;;  %p2555_p6 = pnand %p1765_p3, %p135_p4 }
   0xb   : > { %s2482_s23 = smov [#allocation4]   ;;  %s2368_s28 = scalar_lea.hbm %s3033_s0, 2048 }
   0xc   : > { %s3043_s21 = scalar_select %p2551_p5, 1, 0 }
   0xd   : > { %s3044_s22 = scalar_select %p2555_p6, 1, 0 }
   0xe   : > { %s151_s24 = sshll.u32 %s2482_s23, 4  ;;  %p2239_p7 = pneg %p2555_p6  ;;  %s152_s24 = int_to_ptr.vmem [resolvable:$true] %s151_s24 }
   0xf   : > { %p2369_p9 = scmp.ne.s32.totalorder %s3033_s0, %s2368_s28  ;;  %p2375_p13 = scmp.lt.u32.totalorder %s2368_s28, %s3033_s0 }
  0x10   : > { %p2563_p8 = pnand %p2239_p7, %p2539_p1 }
  0x12   : > { %p2370_p10 = pneg %p2563_p8 }
  0x14   : > { %p2371_p11 = pnand %p2370_p10, %p2369_p9 }
  0x16   : > { %p2372_p12 = pneg %p2371_p11 }
  0x18   : > { %p2377_p0 = pnand %p2375_p13, %p2372_p12 }
  0x1a   : > { %2380 = shalt.err (!%p2377_p0)
}
  0x1b   : > { %s2381_s6 = scalar_lea.vmem %s152_s24, 2048  ;;  %p2389_p5 = scmp.lt.s32.totalorder %s152_s24, %s152_s24 }
  0x1c   : > { %p2382_p3 = scmp.ne.s32.totalorder %s152_s24, %s2381_s6  ;;  %p2390_p1 = scmp.lt.s32.totalorder %s2381_s6, %s2381_s6 }
  0x1e   : > { %p2384_p4 = pnand %p2382_p3, %p2370_p10  ;;  %p2391_p6 = por %p2390_p1, %p2389_p5 }
  0x20   : > { %p2385_p7 = pneg %p2384_p4 }
  0x22   : > { %p2392_p2 = pnand %p2391_p6, %p2385_p7 }
  0x24   : > { %2395 = shalt.err (!%p2392_p2)
}
  0x25   : > { %s2483_s7 = smov 128   ;;  %s2484_s8 = smov 8  }
  0x26   : > { %2242 = dma.hbm_to_vmem [thread:$0]  (!%p2563_p8), %s3033_s0, 2048, %s152_s24, [#allocation5], %s2483_s7, %s2483_s7, %s2484_s8  }
  0x27   : > { %s26_s11 = sadd.s32 1, %s2476_s16  ;;  %s62_s12 = sadd.s32 1, %s2468_s14 }
  0x28   : > { %p27_p1 = scmp.ge.s32.totalorder %s26_s11, 2  ;;  %p69_p2 = scmp.ne.s32.totalorder %s2468_s14, %s2464_s13 }
  0x29   : > { %p70_p5 = scmp.eq.s32.totalorder %s2480_s17, 0  ;;  %p2248_p6 = scmp.lt.s32.totalorder %s2480_s17, 2 }
  0x2a   : > { %s3058_s11 = smov (%p27_p1, %s26_s11), 0  ;;  %p3046_p10 = scmp.ne.s32.totalorder %s3042_s20, 0 }
  0x2b   : > { %p71_p9 = por %p70_p5, %p69_p2  ;;  %s59_s23 = ssub.s32 %s2476_s16, %s3058_s11 }
  0x2c   : > { %p2593_p11 = por %p3046_p10, %p69_p2  ;;  %s168_s25 = sand.u32 1, %s2468_s14  }
  0x2d   : > { %p60_p12 = scmp.eq.s32.totalorder %s59_s23, 0  ;;  %s1768_s24 = sshll.u32 %s168_s25, 9 }
  0x2e   : > { %s1975_s26 = sshll.u32 %s2476_s16, 13  ;;  %s172_s20 = scalar_lea.vmem [#allocation6], %s1768_s24 }
  0x2f   : > { %s2602_s27 = scalar_select %p60_p12, %s2468_s14, %s62_s12  }
  0x30   : > { %s2607_s30 = scalar_lea.hbm %s3034_s1, %s1975_s26  ;;  %s179_s4 = sshll.u32 %s172_s20, 4  ;;  %s2615_s4 = int_to_ptr.vmem [resolvable:$true] %s179_s4 }
  0x31   : > { %p2611_p8 = pnand %p2248_p6, %p71_p9  ;;  %s2617_s6 = scalar_lea.sflag [#allocation7], %s168_s25 }
  0x32   : > { %s2396_s7 = scalar_lea.hbm %s2607_s30, 8192  ;;  %s2401_s10 = scalar_lea.hbm %s3034_s1, 16384 }
  0x33   : > { %p2397_p13 = scmp.ne.s32.totalorder %s2607_s30, %s2396_s7  ;;  %p2398_p0 = pneg %p2611_p8 }
  0x34   : > { %p2402_p7 = scmp.lt.u32.totalorder %s2607_s30, %s3034_s1  ;;  %p2403_p1 = scmp.lt.u32.totalorder %s2401_s10, %s2396_s7 }
  0x35   : > { %p2399_p3 = pnand %p2398_p0, %p2397_p13  ;;  %p2405_p5 = scmp.lt.u32.totalorder %s2396_s7, %s2607_s30 }
  0x36   : > { %p2404_p2 = por %p2403_p1, %p2402_p7 }
  0x37   : > { %p2400_p4 = pneg %p2399_p3 }
  0x38   : > { %p2406_p6 = por %p2405_p5, %p2404_p2 }
  0x3a   : > { %p2407_p9 = pnand %p2406_p6, %p2400_p4 }
  0x3c   : > { %2410 = shalt.err (!%p2407_p9)
}
  0x3d   : > { %s2411_s25 = scalar_lea.vmem %s2615_s4, 8192  ;;  %s2485_s24 = smov [#allocation6]  }
  0x3e   : > { %p2412_p10 = scmp.ne.s32.totalorder %s2615_s4, %s2411_s25  ;;  %s2416_s26 = sshll.u32 %s2485_s24, 4  ;;  %s2417_s26 = int_to_ptr.vmem [resolvable:$false] %s2416_s26 }
  0x3f   : > { %s2418_s28 = scalar_lea.vmem %s2417_s26, 16384  ;;  %p2419_p3 = scmp.lt.s32.totalorder %s2615_s4, %s2417_s26 }
  0x40   : > { %p2414_p12 = pnand %p2412_p10, %p2398_p0  ;;  %p2420_p7 = scmp.lt.s32.totalorder %s2418_s28, %s2411_s25 }
  0x42   : > { %p2415_p13 = pneg %p2414_p12  ;;  %p2421_p1 = por %p2420_p7, %p2419_p3 }
  0x44   : > { %p2422_p2 = pnand %p2421_p1, %p2415_p13 }
  0x46   : > { %2425 = shalt.err (!%p2422_p2)
}
  0x47   : > { %s2486_s29 = smov 64   ;;  %s2487_s20 = smov 4  }
  0x48   : > { %2246 = dma.hbm_to_vmem [thread:$0]  (!%p2611_p8), %s2607_s30, 8192, %s2615_s4, %s2617_s6, %s2486_s29, %s2486_s29, %s2487_s20  }
  0x49   : > { %p3049_p0 = scmp.ne.s32.totalorder %s3044_s22, 0 }
  0x4a   : > { %p3050_p4 = scmp.ne.s32.totalorder (!%p3049_p0), %s3041_s19, 0 }
  0x4b   : > { %191 = sbr.rel (%p3049_p0) target bundleno = 477 (0x1dd), region = 32 }
  0x52   : > { %2451 = dma.done.wait (%p3050_p4), [#allocation5], 2048  }
  0x53   : > { %2453 = vsyncadd (%p3050_p4), [#allocation5], 4294965248  ;;  %s2652_s7 = sand.u32 1, %s2464_s13   ;;  %p3051_p8 = scmp.ne.s32.totalorder %s3043_s21, 0 }
  0x54   : > { %s1773_s8 = sshll.u32 %s2652_s7, 9  ;;  %s198_s9 = scalar_lea.sflag [#allocation7], %s2652_s7 }
  0x55   : > { %s2656_s10 = scalar_lea.vmem [#allocation6], %s1773_s8 }
  0x56   : > { %2455 = dma.done.wait (%p3051_p8), %s198_s9, 8192  }
  0x57   : > { %2457 = vsyncadd (%p3051_p8), %s198_s9, 4294959104  ;;  %v2488_v0 = vmov 0.0   ;;  %v2304_v1 = vld [vmem:[%s2656_s10 + $0x40] sm:$0xff]   ;;  %v2308_v5 = vld [vmem:[%s2656_s10 + $0x48] sm:$0xff]   ;;  %vm283_vm0 = vcmask 523264   ;;  %s1775_s19 = sshll.u32 %s2472_s15, 4 }
  0x58   : > { %226 = vst [vmem:[#allocation2] sm:$0xff] %v2488_v0  ;;  %227 = vst [vmem:[#allocation2 + $0x8] sm:$0x3] %v2488_v0  ;;  %v2305_v2 = vld [vmem:[%s2656_s10 + $0xc0] sm:$0xff]   ;;  %1977 = vmatprep.subr.bf16.mxu0 %v2304_v1  ;;  %v2309_v6 = vld [vmem:[%s2656_s10 + $0xc8] sm:$0xff]   ;;  %s2714_s21 = scalar_lea.vmem [#allocation2], %s1775_s19 }
  0x59   : > { %228 = vst [vmem:[#allocation2 + $0x10] sm:$0xff] %v2488_v0  ;;  %229 = vst [vmem:[#allocation2 + $0x18] sm:$0x3] %v2488_v0  ;;  %v2306_v3 = vld [vmem:[%s2656_s10] sm:$0xff]   ;;  %2041 = vmatprep.subr.bf16.mxu1 %v2305_v2  ;;  %v2310_v7 = vld [vmem:[%s2656_s10 + $0x8] sm:$0xff]   ;;  %s1774_s4 = sshll.u32 %s2652_s7, 8 }
  0x5a   : > { %230 = vst [vmem:[#allocation2 + $0x20] sm:$0xff] %v2488_v0  ;;  %231 = vst [vmem:[#allocation2 + $0x28] sm:$0x3] %v2488_v0  ;;  %v2307_v4 = vld [vmem:[%s2656_s10 + $0x80] sm:$0xff]   ;;  %1978 = vmatpush3.bf16.msra.mxu0 %v2306_v3  ;;  %v2311_v8 = vld [vmem:[%s2656_s10 + $0x88] sm:$0xff]   ;;  %s2879_s5 = scalar_lea.vmem [#allocation8], %s1774_s4 }
  0x5b   : > { %232 = vst [vmem:[#allocation2 + $0x30] sm:$0xff] %v2488_v0  ;;  %233 = vst [vmem:[#allocation2 + $0x38] sm:$0x3] %v2488_v0  ;;  %2042 = vmatpush3.bf16.msra.mxu1 %v2307_v4  ;;  %1979 = vmatprep.subr.bf16.mxu0 %v2308_v5  ;;  %v2312_v9 = vld [vmem:[%s2656_s10 + $0x50] sm:$0xff]   ;;  %v2316_v13 = vld [vmem:[%s2656_s10 + $0x58] sm:$0xff]   ;;  %s1976_s6 = sshll.u32 (%p2593_p11), %s2472_s15, 7 }
  0x5c   : > { %234 = vst [vmem:[#allocation2 + $0x40] sm:$0xff] %v2488_v0  ;;  %235 = vst [vmem:[#allocation2 + $0x48] sm:$0x3] %v2488_v0  ;;  %2043 = vmatprep.subr.bf16.mxu1 %v2309_v6  ;;  %v2313_v10 = vld [vmem:[%s2656_s10 + $0xd0] sm:$0xff]   ;;  %v2317_v14 = vld [vmem:[%s2656_s10 + $0xd8] sm:$0xff]   ;;  %s2952_s25 = scalar_lea.vmem (%p2593_p11), %s3036_s3, %s1976_s6 }
  0x5d   : > { %236 = vst [vmem:[#allocation2 + $0x50] sm:$0xff] %v2488_v0  ;;  %237 = vst [vmem:[#allocation2 + $0x58] sm:$0x3] %v2488_v0  ;;  %v2314_v11 = vld [vmem:[%s2656_s10 + $0x10] sm:$0xff]   ;;  %v2318_v15 = vld [vmem:[%s2656_s10 + $0x18] sm:$0xff]  }
  0x5e   : > { %238 = vst [vmem:[#allocation2 + $0x60] sm:$0xff] %v2488_v0  ;;  %239 = vst [vmem:[#allocation2 + $0x68] sm:$0x3] %v2488_v0  ;;  %1980 = vmatpush3.bf16.msra.mxu0 %v2310_v7  ;;  %v2315_v12 = vld [vmem:[%s2656_s10 + $0x90] sm:$0xff]   ;;  %v2319_v16 = vld [vmem:[%s2656_s10 + $0x98] sm:$0xff]  }
  0x5f   : > { %240 = vst [vmem:[#allocation2 + $0x70] sm:$0xff] %v2488_v0  ;;  %241 = vst [vmem:[#allocation2 + $0x78] sm:$0x3] %v2488_v0  ;;  %2044 = vmatpush3.bf16.msra.mxu1 %v2311_v8  ;;  %1981 = vmatprep.subr.bf16.mxu0 %v2312_v9  ;;  %v2320_v17 = vld [vmem:[%s2656_s10 + $0x60] sm:$0xff]   ;;  %v2324_v21 = vld [vmem:[%s2656_s10 + $0x68] sm:$0xff]  }
  0x60   : > { %242 = vst [vmem:[#allocation2 + $0x80] sm:$0xff] %v2488_v0  ;;  %243 = vst [vmem:[#allocation2 + $0x88] sm:$0x3] %v2488_v0  ;;  %2045 = vmatprep.subr.bf16.mxu1 %v2313_v10  ;;  %v2321_v18 = vld [vmem:[%s2656_s10 + $0xe0] sm:$0xff]   ;;  %v2325_v22 = vld [vmem:[%s2656_s10 + $0xe8] sm:$0xff]  }
  0x61   : > { %244 = vst [vmem:[#allocation2 + $0x90] sm:$0xff] %v2488_v0  ;;  %245 = vst [vmem:[#allocation2 + $0x98] sm:$0x3] %v2488_v0  ;;  %v2322_v19 = vld [vmem:[%s2656_s10 + $0x20] sm:$0xff]   ;;  %v2326_v23 = vld [vmem:[%s2656_s10 + $0x28] sm:$0xff]  }
  0x62   : > { %246 = vst [vmem:[#allocation2 + $0xa0] sm:$0xff] %v2488_v0  ;;  %247 = vst [vmem:[#allocation2 + $0xa8] sm:$0x3] %v2488_v0  ;;  %1982 = vmatpush3.bf16.msra.mxu0 %v2314_v11  ;;  %v2323_v20 = vld [vmem:[%s2656_s10 + $0xa0] sm:$0xff]   ;;  %v2327_v24 = vld [vmem:[%s2656_s10 + $0xa8] sm:$0xff]  }
  0x63   : > { %248 = vst [vmem:[#allocation2 + $0xb0] sm:$0xff] %v2488_v0  ;;  %249 = vst [vmem:[#allocation2 + $0xb8] sm:$0x3] %v2488_v0  ;;  %2046 = vmatpush3.bf16.msra.mxu1 %v2315_v12  ;;  %1983 = vmatprep.subr.bf16.mxu0 %v2316_v13  ;;  %v2328_v25 = vld [vmem:[%s2656_s10 + $0x70] sm:$0xff]   ;;  %v2332_v29 = vld [vmem:[%s2656_s10 + $0x78] sm:$0xff]  }
  0x64   : > { %250 = vst [vmem:[#allocation2 + $0xc0] sm:$0xff] %v2488_v0  ;;  %251 = vst [vmem:[#allocation2 + $0xc8] sm:$0x3] %v2488_v0  ;;  %2047 = vmatprep.subr.bf16.mxu1 %v2317_v14  ;;  %v2329_v26 = vld [vmem:[%s2656_s10 + $0xf0] sm:$0xff]   ;;  %v2333_v30 = vld [vmem:[%s2656_s10 + $0xf8] sm:$0xff]  }
  0x65   : > { %252 = vst [vmem:[#allocation2 + $0xd0] sm:$0xff] %v2488_v0  ;;  %253 = vst [vmem:[#allocation2 + $0xd8] sm:$0x3] %v2488_v0  ;;  %v2330_v27 = vld [vmem:[%s2656_s10 + $0x30] sm:$0xff]   ;;  %v2334_v31 = vld [vmem:[%s2656_s10 + $0x38] sm:$0xff]  }
  0x66   : > { %254 = vst [vmem:[#allocation2 + $0xe0] sm:$0xff] %v2488_v0  ;;  %255 = vst [vmem:[#allocation2 + $0xe8] sm:$0x3] %v2488_v0  ;;  %1984 = vmatpush3.bf16.msra.mxu0 %v2318_v15  ;;  %v2331_v28 = vld [vmem:[%s2656_s10 + $0xb0] sm:$0xff]   ;;  %v2335_v32 = vld [vmem:[%s2656_s10 + $0xb8] sm:$0xff]  }
  0x67   : > { %256 = vst [vmem:[#allocation2 + $0xf0] sm:$0xff] %v2488_v0  ;;  %257 = vst [vmem:[#allocation2 + $0xf8] sm:$0x3] %v2488_v0  ;;  %2048 = vmatpush3.bf16.msra.mxu1 %v2319_v16  ;;  %1985 = vmatprep.subr.bf16.mxu0 %v2320_v17  ;;  %v266_v33 = vld [vmem:[#allocation4] sm:$0xff]  ;;  %v267_v34 = vld [vmem:[#allocation4 + $0x8] sm:$0xff] }
  0x68   : > { %258 = vst [vmem:[#allocation2 + $0x100] sm:$0xff] %v2488_v0  ;;  %259 = vst [vmem:[#allocation2 + $0x108] sm:$0x3] %v2488_v0  ;;  %2049 = vmatprep.subr.bf16.mxu1 %v2321_v18  ;;  %v268_v35 = vld [vmem:[#allocation4 + $0x10] sm:$0xff]  ;;  %v269_v36 = vld [vmem:[#allocation4 + $0x18] sm:$0xff] }
  0x69   : > { %260 = vst [vmem:[#allocation2 + $0x110] sm:$0xff] %v2488_v0  ;;  %261 = vst [vmem:[#allocation2 + $0x118] sm:$0x3] %v2488_v0  ;;  %v270_v37 = vld [vmem:[#allocation4 + $0x20] sm:$0xff]  ;;  %v271_v38 = vld [vmem:[#allocation4 + $0x28] sm:$0xff] }
  0x6a   : > { %262 = vst [vmem:[#allocation2 + $0x120] sm:$0xff] %v2488_v0  ;;  %263 = vst [vmem:[#allocation2 + $0x128] sm:$0x3] %v2488_v0  ;;  %1986 = vmatpush3.bf16.msra.mxu0 %v2322_v19  ;;  %v272_v39 = vld [vmem:[#allocation4 + $0x30] sm:$0xff]  ;;  %v273_v40 = vld [vmem:[#allocation4 + $0x38] sm:$0xff] }
  0x6b   : > { %264 = vst [vmem:[#allocation2 + $0x130] sm:$0xff] %v2488_v0  ;;  %265 = vst [vmem:[#allocation2 + $0x138] sm:$0x3] %v2488_v0  ;;  %2050 = vmatpush3.bf16.msra.mxu1 %v2323_v20  ;;  %1987 = vmatprep.subr.bf16.mxu0 %v2324_v21  ;;  %v274_v41 = vld [vmem:[#allocation4 + $0x40] sm:$0xff]  ;;  %v275_v42 = vld [vmem:[#allocation4 + $0x48] sm:$0xff] }
  0x6c   : > { %2051 = vmatprep.subr.bf16.mxu1 %v2325_v22  ;;  %284 = vst.msk [vmem:[#allocation2 + $0x11] sm:$0xff] %vm283_vm0, %v266_v33  ;;  %285 = vst.msk [vmem:[#allocation2 + $0x21] sm:$0xff] %vm283_vm0, %v267_v34  ;;  %v276_v43 = vld [vmem:[#allocation4 + $0x50] sm:$0xff]  ;;  %v277_v44 = vld [vmem:[#allocation4 + $0x58] sm:$0xff] }
  0x6d   : > { %286 = vst.msk [vmem:[#allocation2 + $0x31] sm:$0xff] %vm283_vm0, %v268_v35  ;;  %287 = vst.msk [vmem:[#allocation2 + $0x41] sm:$0xff] %vm283_vm0, %v269_v36  ;;  %v278_v45 = vld [vmem:[#allocation4 + $0x60] sm:$0xff]  ;;  %v279_v46 = vld [vmem:[#allocation4 + $0x68] sm:$0xff] }
  0x6e   : > { %1988 = vmatpush3.bf16.msra.mxu0 %v2326_v23  ;;  %288 = vst.msk [vmem:[#allocation2 + $0x51] sm:$0xff] %vm283_vm0, %v270_v37  ;;  %289 = vst.msk [vmem:[#allocation2 + $0x61] sm:$0xff] %vm283_vm0, %v271_v38  ;;  %v280_v47 = vld [vmem:[#allocation4 + $0x70] sm:$0xff]  ;;  %v281_v48 = vld [vmem:[#allocation4 + $0x78] sm:$0xff] }
  0x6f   : > { %2052 = vmatpush3.bf16.msra.mxu1 %v2327_v24  ;;  %1989 = vmatprep.subr.bf16.mxu0 %v2328_v25  ;;  %290 = vst.msk [vmem:[#allocation2 + $0x71] sm:$0xff] %vm283_vm0, %v272_v39  ;;  %291 = vst.msk [vmem:[#allocation2 + $0x81] sm:$0xff] %vm283_vm0, %v273_v40  ;;  %v2336_v49 = vld [vmem:[%s2656_s10 + $0x140] sm:$0xff]   ;;  %v2340_v60 = vld [vmem:[%s2656_s10 + $0x148] sm:$0xff]  }
  0x70   : > { %2053 = vmatprep.subr.bf16.mxu1 %v2329_v26  ;;  %292 = vst.msk [vmem:[#allocation2 + $0xb1] sm:$0xff] %vm283_vm0, %v274_v41  ;;  %293 = vst.msk [vmem:[#allocation2 + $0xc1] sm:$0xff] %vm283_vm0, %v275_v42  ;;  %v2338_v50 = vld [vmem:[%s2656_s10 + $0x1c0] sm:$0xff]   ;;  %v2341_v5 = vld [vmem:[%s2656_s10 + $0x108] sm:$0xff]  }
  0x71   : > { %294 = vst.msk [vmem:[#allocation2 + $0xd1] sm:$0xff] %vm283_vm0, %v276_v43  ;;  %295 = vst.msk [vmem:[#allocation2 + $0xe1] sm:$0xff] %vm283_vm0, %v277_v44  ;;  %v2337_v51 = vld [vmem:[%s2656_s10 + $0x100] sm:$0xff]   ;;  %v2342_v6 = vld [vmem:[%s2656_s10 + $0x1c8] sm:$0xff]  }
  0x72   : > { %1990 = vmatpush3.bf16.msra.mxu0 %v2330_v27  ;;  %296 = vst.msk [vmem:[#allocation2 + $0xf1] sm:$0xff] %vm283_vm0, %v278_v45  ;;  %297 = vst.msk [vmem:[#allocation2 + $0x101] sm:$0xff] %vm283_vm0, %v279_v46  ;;  %v2339_v55 = vld [vmem:[%s2656_s10 + $0x180] sm:$0xff]   ;;  %v2343_v8 = vld [vmem:[%s2656_s10 + $0x188] sm:$0xff]  }
  0x73   : > { %2054 = vmatpush3.bf16.msra.mxu1 %v2331_v28  ;;  %1991 = vmatprep.subr.bf16.mxu0 %v2332_v29  ;;  %298 = vst.msk [vmem:[#allocation2 + $0x111] sm:$0xff] %vm283_vm0, %v280_v47  ;;  %299 = vst.msk [vmem:[#allocation2 + $0x121] sm:$0xff] %vm283_vm0, %v281_v48  ;;  %v2344_v13 = vld [vmem:[%s2656_s10 + $0x150] sm:$0xff]   ;;  %v2348_v21 = vld [vmem:[%s2656_s10 + $0x158] sm:$0xff]  }
  0x74   : > { %2055 = vmatprep.subr.bf16.mxu1 %v2333_v30  ;;  %v2346_v14 = vld [vmem:[%s2656_s10 + $0x1d0] sm:$0xff]   ;;  %v2350_v22 = vld [vmem:[%s2656_s10 + $0x1d8] sm:$0xff]   ;;  %v2353_v34 = vld [vmem:[%s2656_s10 + $0x120] sm:$0xff]  }
  0x75   : > { %v2345_v18 = vld [vmem:[%s2656_s10 + $0x110] sm:$0xff]   ;;  %v2349_v25 = vld [vmem:[%s2656_s10 + $0x118] sm:$0xff]   ;;  %v2354_v35 = vld [vmem:[%s2656_s10 + $0x1e0] sm:$0xff]  }
  0x76   : > { %1992 = vmatpush3.bf16.msra.mxu0 %v2334_v31  ;;  %v2347_v20 = vld [vmem:[%s2656_s10 + $0x190] sm:$0xff]   ;;  %v2351_v28 = vld [vmem:[%s2656_s10 + $0x198] sm:$0xff]   ;;  %v2355_v38 = vld [vmem:[%s2656_s10 + $0x1a0] sm:$0xff]  }
  0x77   : > { %2056 = vmatpush3.bf16.msra.mxu1 %v2335_v32  ;;  %2105 = vmatprep.subr.bf16.mxu0 %v2336_v49  ;;  %v2352_v32 = vld [vmem:[%s2656_s10 + $0x160] sm:$0xff]   ;;  %v2356_v41 = vld [vmem:[%s2656_s10 + $0x168] sm:$0xff]  }
  0x78   : > { %2169 = vmatprep.subr.bf16.mxu1 %v2338_v50  ;;  %v2357_v42 = vld [vmem:[%s2656_s10 + $0x128] sm:$0xff]   ;;  %v2360_v50 = vld [vmem:[%s2656_s10 + $0x170] sm:$0xff]  }
  0x79   : > { %v2358_v44 = vld [vmem:[%s2656_s10 + $0x1e8] sm:$0xff]  }
  0x7a   : > { %v1777_v52 = vld [vmem:[%s2714_s21 + $0x10] sm:$0xff]  ;;  %v1778_v53 = vld [vmem:[%s2714_s21 + $0x20] sm:$0xff]  ;;  %v2359_v47 = vld [vmem:[%s2656_s10 + $0x1a8] sm:$0xff]  }
  0x7b   : > { %v1793_v54 = vld [vmem:[%s2714_s21 + $0x11] sm:$0xff]  ;;  %v353_v56 = vpack.c.bf16 %v1778_v53, %v1777_v52  ;;  %v1794_v57 = vld [vmem:[%s2714_s21 + $0x21] sm:$0xff] }
  0x7c   : > { %v302_v58 = vld [vmem:[%s2714_s21] sm:$0xff]  ;;  %v2724_v61 = vpack.c.bf16 %v1794_v57, %v1793_v54  ;;  %v1779_v0 = vld [vmem:[%s2714_s21 + $0x30] sm:$0xff] }
  0x7d   : > { %v369_v59 = vld [vmem:[%s2714_s21 + $0x1] sm:$0xff]  ;;  %v318_v62 = vpack.c.bf16 %v1777_v52, %v302_v58  ;;  %v1795_v2 = vld [vmem:[%s2714_s21 + $0x31] sm:$0xff]  ;;  %824 = vmatprep.mubr.bf16.mxu0 %v353_v56  ;;  %v319_v15 = vpack.c.bf16 %v1779_v0, %v1778_v53 }
  0x7e   : > { %v2726_v63 = vpack.c.bf16 %v1793_v54, %v369_v59  ;;  %v1780_v1 = vld [vmem:[%s2714_s21 + $0x40] sm:$0xff]  ;;  %921 = vmatprep.mubr.bf16.mxu1 %v2724_v61  ;;  %v1781_v9 = vld [vmem:[%s2714_s21 + $0x50] sm:$0xff]  ;;  %v2748_v16 = vpack.c.bf16 %v1795_v2, %v1794_v57 }
  0x7f   : > { %v354_v3 = vpack.c.bf16 %v1780_v1, %v1779_v0  ;;  %v1796_v4 = vld [vmem:[%s2714_s21 + $0x41] sm:$0xff]  ;;  %825 = vmatmul.mubr.bf16.vlgmr.msra.gmra.mrb[0].mxu0 %v318_v62  ;;  %v1797_v11 = vld [vmem:[%s2714_s21 + $0x51] sm:$0xff]  ;;  %v320_v29 = vpack.c.bf16 %v1781_v9, %v1780_v1 }
  0x80   : > { %v2735_v7 = vpack.c.bf16 %v1796_v4, %v1795_v2  ;;  %v2740_v10 = vld [vmem:[%s2714_s21 + $0x60] sm:$0xff]  ;;  %922 = vmatmul.mubr.bf16.vlgmr.msra.gmra.mrb[0].mxu1 %v2726_v63  ;;  %2106 = vmatpush3.bf16.msra.mxu0 %v2337_v51  ;;  %v1783_v23 = vld [vmem:[%s2714_s21 + $0x70] sm:$0xff]  ;;  %v2765_v30 = vpack.c.bf16 %v1797_v11, %v1796_v4  ;;  %v2364_v0 = vld [vmem:[%s2656_s10 + $0x178] sm:$0xff]  }
  0x81   : > { %v1798_v12 = vld [vmem:[%s2714_s21 + $0x61] sm:$0xff]  ;;  %2170 = vmatpush3.bf16.msra.mxu1 %v2339_v55  ;;  %832 = vmatprep.mubr.bf16.mxu0 %v354_v3  ;;  %v355_v17 = vpack.c.bf16 %v2740_v10, %v1781_v9  ;;  %v1799_v26 = vld [vmem:[%s2714_s21 + $0x71] sm:$0xff]  ;;  %v321_v43 = vpack.c.bf16 %v1783_v23, %v2740_v10 }
  0x82   : > { %929 = vmatprep.mubr.bf16.mxu1 %v2735_v7  ;;  %2107 = vmatprep.subr.bf16.mxu0 %v2340_v60  ;;  %v2752_v19 = vpack.c.bf16 %v1798_v12, %v1797_v11  ;;  %v1784_v24 = vld [vmem:[%s2714_s21 + $0x80] sm:$0xff]  ;;  %v1785_v36 = vld [vmem:[%s2714_s21 + $0xb0] sm:$0xff]  ;;  %v2785_v45 = vpack.c.bf16 %v1799_v26, %v1798_v12  ;;  %v2365_v2 = vld [vmem:[%s2656_s10 + $0x138] sm:$0xff]  }
  0x83   : > { %2171 = vmatprep.subr.bf16.mxu1 %v2342_v6  ;;  %v1800_v27 = vld [vmem:[%s2714_s21 + $0x81] sm:$0xff]  ;;  %v356_v31 = vpack.c.bf16 %v1784_v24, %v1783_v23  ;;  %v1801_v39 = vld [vmem:[%s2714_s21 + $0xb1] sm:$0xff] }
  0x84   : > { %2108 = vmatpush3.bf16.msra.mxu0 %v2341_v5  ;;  %v2768_v33 = vpack.c.bf16 %v1800_v27, %v1799_v26  ;;  %v2774_v37 = vld [vmem:[%s2714_s21 + $0xc0] sm:$0xff]  ;;  %v1787_v52 = vld [vmem:[%s2714_s21 + $0xd0] sm:$0xff]  ;;  %v2366_v3 = vld [vmem:[%s2656_s10 + $0x1f8] sm:$0xff]  }
  0x85   : > { %2172 = vmatpush3.bf16.msra.mxu1 %v2343_v8  ;;  %2109 = vmatprep.subr.bf16.mxu0 %v2344_v13  ;;  %v1802_v40 = vld [vmem:[%s2714_s21 + $0xc1] sm:$0xff]  ;;  %v357_v46 = vpack.c.bf16 %v2774_v37, %v1785_v36  ;;  %v2361_v54 = vld [vmem:[%s2656_s10 + $0x130] sm:$0xff]   ;;  %v2367_v4 = vld [vmem:[%s2656_s10 + $0x1b8] sm:$0xff]   ;;  %v323_v10 = vpack.c.bf16 %v1787_v52, %v2774_v37 }
  0x86   : > { %2173 = vmatprep.subr.bf16.mxu1 %v2346_v14  ;;  %v2789_v48 = vpack.c.bf16 %v1802_v40, %v1801_v39  ;;  %v310_v49 = vld [vmem:[%s2714_s21 + $0xa0] sm:$0xff]  ;;  %v2362_v55 = vld [vmem:[%s2656_s10 + $0x1f0] sm:$0xff]  }
  0x87   : > { %833 = vmatmul.mubr.bf16.gmra.mrb[4].mxu0 %v319_v15  ;;  %v377_v51 = vld [vmem:[%s2714_s21 + $0xa1] sm:$0xff]  ;;  %v2363_v56 = vld [vmem:[%s2656_s10 + $0x1b0] sm:$0xff]   ;;  %v322_v59 = vpack.c.bf16 %v1785_v36, %v310_v49 }
  0x88   : > { %930 = vmatmul.mubr.bf16.gmra.mrb[4].mxu1 %v2748_v16  ;;  %840 = vmatprep.mubr.bf16.mxu0 %v355_v17  ;;  %v1788_v53 = vld [vmem:[%s2714_s21 + $0xe0] sm:$0xff]  ;;  %v1803_v57 = vld [vmem:[%s2714_s21 + $0xd1] sm:$0xff]  ;;  %v2803_v60 = vpack.c.bf16 %v1801_v39, %v377_v51 }
  0x89   : > { %937 = vmatprep.mubr.bf16.mxu1 %v2752_v19  ;;  %2110 = vmatpush3.bf16.msra.mxu0 %v2345_v18  ;;  %v1804_v58 = vld [vmem:[%s2714_s21 + $0xe1] sm:$0xff]  ;;  %v358_v62 = vpack.c.bf16 %v1788_v53, %v1787_v52  ;;  %v1789_v5 = vld [vmem:[%s2714_s21 + $0xf0] sm:$0xff]  ;;  %v2818_v11 = vpack.c.bf16 %v1803_v57, %v1802_v40 }
  0x8a   : > { %2174 = vmatpush3.bf16.msra.mxu1 %v2347_v20  ;;  %2111 = vmatprep.subr.bf16.mxu0 %v2348_v21  ;;  %v2806_v1 = vpack.c.bf16 %v1804_v58, %v1803_v57  ;;  %v1790_v6 = vld [vmem:[%s2714_s21 + $0x100] sm:$0xff]  ;;  %v1805_v8 = vld [vmem:[%s2714_s21 + $0xf1] sm:$0xff]  ;;  %v324_v20 = vpack.c.bf16 %v1789_v5, %v1788_v53 }
  0x8b   : > { %2175 = vmatprep.subr.bf16.mxu1 %v2350_v22  ;;  %v1806_v9 = vld [vmem:[%s2714_s21 + $0x101] sm:$0xff]  ;;  %v359_v12 = vpack.c.bf16 %v1790_v6, %v1789_v5  ;;  %v1791_v14 = vld [vmem:[%s2714_s21 + $0x110] sm:$0xff]  ;;  %v2828_v21 = vpack.c.bf16 %v1805_v8, %v1804_v58  ;;  %v2874_v57 = vld [vmem:[%s3035_s2] ss:$0 sm:$0xff] }
  0x8c   : > { %v2820_v13 = vpack.c.bf16 %v1806_v9, %v1805_v8  ;;  %v1792_v15 = vld [vmem:[%s2714_s21 + $0x120] sm:$0xff]  ;;  %v1807_v17 = vld [vmem:[%s2714_s21 + $0x111] sm:$0xff]  ;;  %v325_v26 = vpack.c.bf16 %v1791_v14, %v1790_v6 }
  0x8d   : > { %2112 = vmatpush3.bf16.msra.mxu0 %v2349_v25  ;;  %v1808_v18 = vld [vmem:[%s2714_s21 + $0x121] sm:$0xff]  ;;  %v360_v22 = vpack.c.bf16 %v1792_v15, %v1791_v14  ;;  %v1809_v24 = vld [vmem:[%s2714_s21 + $0x12] sm:$0xff]  ;;  %v2836_v27 = vpack.c.bf16 %v1807_v17, %v1806_v9 }
  0x8e   : > { %2176 = vmatpush3.bf16.msra.mxu1 %v2351_v28  ;;  %2113 = vmatprep.subr.bf16.mxu0 %v2352_v32  ;;  %v2830_v23 = vpack.c.bf16 %v1808_v18, %v1807_v17  ;;  %v1810_v25 = vld [vmem:[%s2714_s21 + $0x22] sm:$0xff]  ;;  %v1813_v36 = vld [vmem:[%s2714_s21 + $0x52] sm:$0xff] }
  0x8f   : > { %841 = vmatmul.mubr.bf16.gmra.mrb[8].mxu0 %v320_v29  ;;  %2177 = vmatprep.subr.bf16.mxu1 %v2354_v35  ;;  %v481_v28 = vpack.c.bf16 %v1810_v25, %v1809_v24  ;;  %v433_v29 = vld [vmem:[%s2714_s21 + $0x2] sm:$0xff]  ;;  %v1815_v39 = vld [vmem:[%s2714_s21 + $0x72] sm:$0xff] }
  0x90   : > { %938 = vmatmul.mubr.bf16.gmra.mrb[8].mxu1 %v2765_v30  ;;  %848 = vmatprep.mubr.bf16.mxu0 %v356_v31  ;;  %v1811_v31 = vld [vmem:[%s2714_s21 + $0x32] sm:$0xff]  ;;  %v1812_v32 = vld [vmem:[%s2714_s21 + $0x42] sm:$0xff] }
  0x91   : > { %945 = vmatprep.mubr.bf16.mxu1 %v2768_v33  ;;  %2114 = vmatpush3.bf16.msra.mxu0 %v2353_v34  ;;  %v449_v34 = vpack.c.bf16 %v1809_v24, %v433_v29  ;;  %v482_v35 = vpack.c.bf16 %v1812_v32, %v1811_v31  ;;  %v1814_v37 = vld [vmem:[%s2714_s21 + $0x62] sm:$0xff] }
  0x92   : > { %2178 = vmatpush3.bf16.msra.mxu1 %v2355_v38  ;;  %2115 = vmatprep.subr.bf16.mxu0 %v2356_v41  ;;  %v450_v38 = vpack.c.bf16 %v1811_v31, %v1810_v25  ;;  %v1816_v40 = vld [vmem:[%s2714_s21 + $0x82] sm:$0xff]  ;;  %v1817_v41 = vld [vmem:[%s2714_s21 + $0xb2] sm:$0xff] }
  0x93   : > { %2179 = vmatprep.subr.bf16.mxu1 %v2358_v44  ;;  %v1819_v44 = vld [vmem:[%s2714_s21 + $0xd2] sm:$0xff]  ;;  %v1822_v49 = vld [vmem:[%s2714_s21 + $0x102] sm:$0xff] }
  0x94   : > { %v1824_v51 = vld [vmem:[%s2714_s21 + $0x122] sm:$0xff] }
  0x95   : > { %2116 = vmatpush3.bf16.msra.mxu0 %v2357_v42  ;;  %v1818_v42 = vld [vmem:[%s2714_s21 + $0xc2] sm:$0xff] }
  0x96   : > { %2180 = vmatpush3.bf16.msra.mxu1 %v2359_v47  ;;  %2117 = vmatprep.subr.bf16.mxu0 %v2360_v50  ;;  %v1821_v47 = vld [vmem:[%s2714_s21 + $0xf2] sm:$0xff] }
  0x97   : > { %849 = vmatmul.mubr.bf16.gmra.mrb[12].mxu0 %v321_v43  ;;  %2181 = vmatprep.subr.bf16.mxu1 %v2362_v55  ;;  %v441_v43 = vld [vmem:[%s2714_s21 + $0xa2] sm:$0xff]  ;;  %v487_v50 = vpack.c.bf16 %v1822_v49, %v1821_v47 }
  0x98   : > { %946 = vmatmul.mubr.bf16.gmra.mrb[12].mxu1 %v2785_v45  ;;  %856 = vmatprep.mubr.bf16.mxu0 %v357_v46  ;;  %v453_v46 = vpack.c.bf16 %v1817_v41, %v441_v43 }
  0x99   : > { %953 = vmatprep.mubr.bf16.mxu1 %v2789_v48  ;;  %2118 = vmatpush3.bf16.msra.mxu0 %v2361_v54 }
  0x9a   : > { %2182 = vmatpush3.bf16.msra.mxu1 %v2363_v56  ;;  %2119 = vmatprep.subr.bf16.mxu0 %v2364_v0 }
  0x9b   : > { %2183 = vmatprep.subr.bf16.mxu1 %v2366_v3 }
  0x9d   : > { %2120 = vmatpush3.bf16.msra.mxu0 %v2365_v2 }
  0x9e   : > { %2184 = vmatpush3.bf16.msra.mxu1 %v2367_v4 }
  0x9f   : > { %857 = vmatmul.mubr.bf16.gmra.mrb[16].mxu0 %v322_v59 }
  0xa0   : > { %954 = vmatmul.mubr.bf16.gmra.mrb[16].mxu1 %v2803_v60  ;;  %864 = vmatprep.mubr.bf16.mxu0 %v358_v62 }
  0xa1   : > { %961 = vmatprep.mubr.bf16.mxu1 %v2806_v1 }
  0xa7   : > { %865 = vmatmul.mubr.bf16.gmra.mrb[20].mxu0 %v323_v10 }
  0xa8   : > { %962 = vmatmul.mubr.bf16.gmra.mrb[20].mxu1 %v2818_v11  ;;  %872 = vmatprep.mubr.bf16.mxu0 %v359_v12 }
  0xa9   : > { %969 = vmatprep.mubr.bf16.mxu1 %v2820_v13 }
  0xaf   : > { %873 = vmatmul.mubr.bf16.gmra.mrb[24].mxu0 %v324_v20 }
  0xb0   : > { %970 = vmatmul.mubr.bf16.gmra.mrb[24].mxu1 %v2828_v21  ;;  %880 = vmatprep.mubr.bf16.mxu0 %v360_v22 }
  0xb1   : > { %977 = vmatprep.mubr.bf16.mxu1 %v2830_v23 }
  0xb7   : > { %881 = vmatmul.mubr.bf16.gmra.mrb[28].mxu0 %v325_v26 }
  0xb8   : > { %978 = vmatmul.mubr.bf16.gmra.mrb[28].mxu1 %v2836_v27  ;;  %1323 = vmatprep.mubr.bf16.mxu0 %v2724_v61  ;;  %v483_v61 = vpack.c.bf16 %v1814_v37, %v1813_v36 }
  0xb9   : > { %1420 = vmatprep.mubr.bf16.mxu1 %v481_v28 }
  0xbf   : > { %1324 = vmatmul.mubr.bf16.vlgmr.msra.gmra.mrb[32].mxu0 %v2726_v63  ;;  %v451_v63 = vpack.c.bf16 %v1813_v36, %v1812_v32 }
  0xc0   : > { %1421 = vmatmul.mubr.bf16.vlgmr.msra.gmra.mrb[32].mxu1 %v449_v34  ;;  %1331 = vmatprep.mubr.bf16.mxu0 %v2735_v7  ;;  %v484_v7 = vpack.c.bf16 %v1816_v40, %v1815_v39 }
  0xc1   : > { %1428 = vmatprep.mubr.bf16.mxu1 %v482_v35 }
  0xc7   : > { %1332 = vmatmul.mubr.bf16.gmra.mrb[36].mxu0 %v2748_v16  ;;  %v452_v16 = vpack.c.bf16 %v1815_v39, %v1814_v37 }
  0xc8   : > { %1429 = vmatmul.mubr.bf16.gmra.mrb[36].mxu1 %v450_v38  ;;  %1339 = vmatprep.mubr.bf16.mxu0 %v2752_v19  ;;  %v485_v19 = vpack.c.bf16 %v1818_v42, %v1817_v41 }
  0xc9   : > { %1436 = vmatprep.mubr.bf16.mxu1 %v483_v61 }
  0xcf   : > { %1340 = vmatmul.mubr.bf16.gmra.mrb[40].mxu0 %v2765_v30  ;;  %v1820_v30 = vld [vmem:[%s2714_s21 + $0xe2] sm:$0xff] }
  0xd0   : > { %1437 = vmatmul.mubr.bf16.gmra.mrb[40].mxu1 %v451_v63  ;;  %1347 = vmatprep.mubr.bf16.mxu0 %v2768_v33  ;;  %v486_v33 = vpack.c.bf16 %v1820_v30, %v1819_v44  ;;  %v455_v52 = vpack.c.bf16 %v1821_v47, %v1820_v30 }
  0xd1   : > { %1444 = vmatprep.mubr.bf16.mxu1 %v484_v7 }
  0xd7   : > { %1348 = vmatmul.mubr.bf16.gmra.mrb[44].mxu0 %v2785_v45  ;;  %v454_v45 = vpack.c.bf16 %v1819_v44, %v1818_v42 }
  0xd8   : > { %1445 = vmatmul.mubr.bf16.gmra.mrb[44].mxu1 %v452_v16  ;;  %1355 = vmatprep.mubr.bf16.mxu0 %v2789_v48  ;;  %v1823_v48 = vld [vmem:[%s2714_s21 + $0x112] sm:$0xff] }
  0xd9   : > { %1452 = vmatprep.mubr.bf16.mxu1 %v485_v19  ;;  %v488_v53 = vpack.c.bf16 %v1824_v51, %v1823_v48  ;;  %v456_v54 = vpack.c.bf16 %v1823_v48, %v1822_v49 }
  0xdf   : > { %1356 = vmatmul.mubr.bf16.gmra.mrb[48].mxu0 %v2803_v60 }
  0xe0   : > { %1453 = vmatmul.mubr.bf16.gmra.mrb[48].mxu1 %v453_v46  ;;  %1363 = vmatprep.mubr.bf16.mxu0 %v2806_v1 }
  0xe1   : > { %1460 = vmatprep.mubr.bf16.mxu1 %v486_v33 }
  0xe7   : > { %1364 = vmatmul.mubr.bf16.gmra.mrb[52].mxu0 %v2818_v11 }
  0xe8   : > { %1461 = vmatmul.mubr.bf16.gmra.mrb[52].mxu1 %v454_v45  ;;  %1371 = vmatprep.mubr.bf16.mxu0 %v2820_v13 }
  0xe9   : > { %1468 = vmatprep.mubr.bf16.mxu1 %v487_v50 }
  0xef   : > { %1372 = vmatmul.mubr.bf16.gmra.mrb[56].mxu0 %v2828_v21 }
  0xf0   : > { %1469 = vmatmul.mubr.bf16.gmra.mrb[56].mxu1 %v455_v52  ;;  %1379 = vmatprep.mubr.bf16.mxu0 %v2830_v23 }
  0xf1   : > { %1476 = vmatprep.mubr.bf16.mxu1 %v488_v53 }
  0xf7   : > { %1380 = vmatmul.mubr.bf16.gmra.mrb[60].mxu0 %v2836_v27 }
  0xf8   : > { %1477 = vmatmul.mubr.bf16.gmra.mrb[60].mxu1 %v456_v54 }
 0x152   : > { %v1993_v55 = vpop.f32.mrb[0].mxu0 }
 0x153   : > { %v2057_v56 = vpop.f32.mrb[0].mxu1  ;;  %v1994_v58 = vpop.f32.mrb[1].mxu0 }
 0x154   : > { %v1995_v59 = vadd.f32 %v1994_v58, %v1993_v55  ;;  %v2058_v60 = vpop.f32.mrb[1].mxu1  ;;  %v1996_v62 = vpop.f32.mrb[2].mxu0 }
 0x155   : > { %v2059_v0 = vadd.f32 %v2058_v60, %v2057_v56  ;;  %v2060_v1 = vpop.f32.mrb[2].mxu1  ;;  %v1997_v2 = vpop.f32.mrb[3].mxu0 }
 0x156   : > { %v827_v3 = vadd.f32 %v1995_v59, %v2874_v57  ;;  %v1998_v4 = vadd.f32 %v1997_v2, %v1996_v62  ;;  %v2061_v5 = vpop.f32.mrb[3].mxu1 }
 0x157   : > { %v2062_v6 = vadd.f32 %v2061_v5, %v2060_v1 }
 0x158   : > { %v924_v8 = vadd.f32 %v2059_v0, %v827_v3  ;;  %v830_v9 = vadd.f32 %v1998_v4, %v2874_v57 }
 0x15a   : > { %986 = vst [vmem:[%s2879_s5] sm:$0xff] %v924_v8  ;;  %v927_v10 = vadd.f32 %v2062_v6, %v830_v9  ;;  %v1999_v11 = vpop.f32.mrb[4].mxu0 }
 0x15b   : > { %v2063_v12 = vpop.f32.mrb[4].mxu1  ;;  %v2000_v13 = vpop.f32.mrb[5].mxu0 }
 0x15c   : > { %987 = vst [vmem:[%s2879_s5 + $0x8] sm:$0xff] %v927_v10  ;;  %v2001_v14 = vadd.f32 %v2000_v13, %v1999_v11  ;;  %v2064_v15 = vpop.f32.mrb[5].mxu1  ;;  %v2002_v17 = vpop.f32.mrb[6].mxu0 }
 0x15d   : > { %v2065_v18 = vadd.f32 %v2064_v15, %v2063_v12  ;;  %v2066_v20 = vpop.f32.mrb[6].mxu1  ;;  %v2003_v21 = vpop.f32.mrb[7].mxu0 }
 0x15e   : > { %v835_v22 = vadd.f32 %v2001_v14, %v2874_v57  ;;  %v2004_v23 = vadd.f32 %v2003_v21, %v2002_v17  ;;  %v2067_v24 = vpop.f32.mrb[7].mxu1 }
 0x15f   : > { %v2068_v25 = vadd.f32 %v2067_v24, %v2066_v20 }
 0x160   : > { %v932_v26 = vadd.f32 %v2065_v18, %v835_v22  ;;  %v838_v27 = vadd.f32 %v2004_v23, %v2874_v57 }
 0x162   : > { %988 = vst [vmem:[%s2879_s5 + $0x10] sm:$0xff] %v932_v26  ;;  %v935_v28 = vadd.f32 %v2068_v25, %v838_v27  ;;  %v2005_v29 = vpop.f32.mrb[8].mxu0 }
 0x163   : > { %v2069_v31 = vpop.f32.mrb[8].mxu1  ;;  %v2006_v32 = vpop.f32.mrb[9].mxu0 }
 0x164   : > { %989 = vst [vmem:[%s2879_s5 + $0x18] sm:$0xff] %v935_v28  ;;  %v2007_v34 = vadd.f32 %v2006_v32, %v2005_v29  ;;  %v2070_v35 = vpop.f32.mrb[9].mxu1  ;;  %v2008_v36 = vpop.f32.mrb[10].mxu0 }
 0x165   : > { %v2071_v37 = vadd.f32 %v2070_v35, %v2069_v31  ;;  %v2072_v38 = vpop.f32.mrb[10].mxu1  ;;  %v2009_v61 = vpop.f32.mrb[11].mxu0 }
 0x166   : > { %v843_v39 = vadd.f32 %v2007_v34, %v2874_v57  ;;  %v2010_v40 = vadd.f32 %v2009_v61, %v2008_v36  ;;  %v2073_v63 = vpop.f32.mrb[11].mxu1 }
 0x167   : > { %v2074_v7 = vadd.f32 %v2073_v63, %v2072_v38 }
 0x168   : > { %v940_v41 = vadd.f32 %v2071_v37, %v843_v39  ;;  %v846_v42 = vadd.f32 %v2010_v40, %v2874_v57 }
 0x16a   : > { %990 = vst [vmem:[%s2879_s5 + $0x20] sm:$0xff] %v940_v41  ;;  %v943_v16 = vadd.f32 %v2074_v7, %v846_v42  ;;  %v2011_v19 = vpop.f32.mrb[12].mxu0 }
 0x16b   : > { %v2075_v43 = vpop.f32.mrb[12].mxu1  ;;  %v2012_v44 = vpop.f32.mrb[13].mxu0 }
 0x16c   : > { %991 = vst [vmem:[%s2879_s5 + $0x28] sm:$0xff] %v943_v16  ;;  %v2013_v30 = vadd.f32 %v2012_v44, %v2011_v19  ;;  %v2076_v46 = vpop.f32.mrb[13].mxu1  ;;  %v2014_v33 = vpop.f32.mrb[14].mxu0 }
 0x16d   : > { %v2077_v47 = vadd.f32 %v2076_v46, %v2075_v43  ;;  %v2078_v49 = vpop.f32.mrb[14].mxu1  ;;  %v2015_v45 = vpop.f32.mrb[15].mxu0 }
 0x16e   : > { %v851_v50 = vadd.f32 %v2013_v30, %v2874_v57  ;;  %v2016_v48 = vadd.f32 %v2015_v45, %v2014_v33  ;;  %v2079_v51 = vpop.f32.mrb[15].mxu1 }
 0x16f   : > { %v2080_v52 = vadd.f32 %v2079_v51, %v2078_v49 }
 0x170   : > { %v948_v53 = vadd.f32 %v2077_v47, %v851_v50  ;;  %v854_v54 = vadd.f32 %v2016_v48, %v2874_v57 }
 0x172   : > { %992 = vst [vmem:[%s2879_s5 + $0x30] sm:$0xff] %v948_v53  ;;  %v951_v55 = vadd.f32 %v2080_v52, %v854_v54  ;;  %v2017_v56 = vpop.f32.mrb[16].mxu0 }
 0x173   : > { %v2081_v58 = vpop.f32.mrb[16].mxu1  ;;  %v2018_v59 = vpop.f32.mrb[17].mxu0 }
 0x174   : > { %993 = vst [vmem:[%s2879_s5 + $0x38] sm:$0xff] %v951_v55  ;;  %v2019_v60 = vadd.f32 %v2018_v59, %v2017_v56  ;;  %v2082_v62 = vpop.f32.mrb[17].mxu1  ;;  %v2020_v0 = vpop.f32.mrb[18].mxu0 }
 0x175   : > { %v2083_v1 = vadd.f32 %v2082_v62, %v2081_v58  ;;  %v2084_v2 = vpop.f32.mrb[18].mxu1  ;;  %v2021_v3 = vpop.f32.mrb[19].mxu0 }
 0x176   : > { %v859_v4 = vadd.f32 %v2019_v60, %v2874_v57  ;;  %v2022_v5 = vadd.f32 %v2021_v3, %v2020_v0  ;;  %v2085_v6 = vpop.f32.mrb[19].mxu1 }
 0x177   : > { %v2086_v8 = vadd.f32 %v2085_v6, %v2084_v2 }
 0x178   : > { %v956_v9 = vadd.f32 %v2083_v1, %v859_v4  ;;  %v862_v10 = vadd.f32 %v2022_v5, %v2874_v57 }
 0x17a   : > { %994 = vst [vmem:[%s2879_s5 + $0x80] sm:$0xff] %v956_v9  ;;  %v959_v11 = vadd.f32 %v2086_v8, %v862_v10  ;;  %v2023_v12 = vpop.f32.mrb[20].mxu0 }
 0x17b   : > { %v2087_v13 = vpop.f32.mrb[20].mxu1  ;;  %v2024_v14 = vpop.f32.mrb[21].mxu0 }
 0x17c   : > { %995 = vst [vmem:[%s2879_s5 + $0x88] sm:$0xff] %v959_v11  ;;  %v2025_v15 = vadd.f32 %v2024_v14, %v2023_v12  ;;  %v2088_v17 = vpop.f32.mrb[21].mxu1  ;;  %v2026_v18 = vpop.f32.mrb[22].mxu0 }
 0x17d   : > { %v2089_v20 = vadd.f32 %v2088_v17, %v2087_v13  ;;  %v2090_v21 = vpop.f32.mrb[22].mxu1  ;;  %v2027_v22 = vpop.f32.mrb[23].mxu0 }
 0x17e   : > { %v867_v23 = vadd.f32 %v2025_v15, %v2874_v57  ;;  %v2028_v24 = vadd.f32 %v2027_v22, %v2026_v18  ;;  %v2091_v25 = vpop.f32.mrb[23].mxu1 }
 0x17f   : > { %v2092_v26 = vadd.f32 %v2091_v25, %v2090_v21 }
 0x180   : > { %v964_v27 = vadd.f32 %v2089_v20, %v867_v23  ;;  %v870_v28 = vadd.f32 %v2028_v24, %v2874_v57 }
 0x182   : > { %996 = vst [vmem:[%s2879_s5 + $0x90] sm:$0xff] %v964_v27  ;;  %v967_v29 = vadd.f32 %v2092_v26, %v870_v28  ;;  %v2029_v31 = vpop.f32.mrb[24].mxu0 }
 0x183   : > { %v2093_v32 = vpop.f32.mrb[24].mxu1  ;;  %v2030_v34 = vpop.f32.mrb[25].mxu0 }
 0x184   : > { %997 = vst [vmem:[%s2879_s5 + $0x98] sm:$0xff] %v967_v29  ;;  %v2031_v35 = vadd.f32 %v2030_v34, %v2029_v31  ;;  %v2094_v36 = vpop.f32.mrb[25].mxu1  ;;  %v2032_v37 = vpop.f32.mrb[26].mxu0 }
 0x185   : > { %v2095_v38 = vadd.f32 %v2094_v36, %v2093_v32  ;;  %v2096_v61 = vpop.f32.mrb[26].mxu1  ;;  %v2033_v39 = vpop.f32.mrb[27].mxu0 }
 0x186   : > { %v875_v40 = vadd.f32 %v2031_v35, %v2874_v57  ;;  %v2034_v63 = vadd.f32 %v2033_v39, %v2032_v37  ;;  %v2097_v7 = vpop.f32.mrb[27].mxu1 }
 0x187   : > { %v2098_v41 = vadd.f32 %v2097_v7, %v2096_v61 }
 0x188   : > { %v972_v42 = vadd.f32 %v2095_v38, %v875_v40  ;;  %v878_v16 = vadd.f32 %v2034_v63, %v2874_v57 }
 0x18a   : > { %998 = vst [vmem:[%s2879_s5 + $0xa0] sm:$0xff] %v972_v42  ;;  %v975_v19 = vadd.f32 %v2098_v41, %v878_v16  ;;  %v2035_v43 = vpop.f32.mrb[28].mxu0 }
 0x18b   : > { %v2099_v44 = vpop.f32.mrb[28].mxu1  ;;  %v2036_v30 = vpop.f32.mrb[29].mxu0 }
 0x18c   : > { %999 = vst [vmem:[%s2879_s5 + $0xa8] sm:$0xff] %v975_v19  ;;  %v2037_v46 = vadd.f32 %v2036_v30, %v2035_v43  ;;  %v2100_v33 = vpop.f32.mrb[29].mxu1  ;;  %v2038_v47 = vpop.f32.mrb[30].mxu0 }
 0x18d   : > { %v2101_v49 = vadd.f32 %v2100_v33, %v2099_v44  ;;  %v2102_v45 = vpop.f32.mrb[30].mxu1  ;;  %v2039_v50 = vpop.f32.mrb[31].mxu0 }
 0x18e   : > { %v883_v48 = vadd.f32 %v2037_v46, %v2874_v57  ;;  %v2040_v51 = vadd.f32 %v2039_v50, %v2038_v47  ;;  %v2103_v52 = vpop.f32.mrb[31].mxu1 }
 0x18f   : > { %v2104_v53 = vadd.f32 %v2103_v52, %v2102_v45 }
 0x190   : > { %v980_v54 = vadd.f32 %v2101_v49, %v883_v48  ;;  %v886_v55 = vadd.f32 %v2040_v51, %v2874_v57 }
 0x192   : > { %1000 = vst [vmem:[%s2879_s5 + $0xb0] sm:$0xff] %v980_v54  ;;  %v983_v56 = vadd.f32 %v2104_v53, %v886_v55  ;;  %v2121_v58 = vpop.f32.mrb[32].mxu0 }
 0x193   : > { %v2185_v59 = vpop.f32.mrb[32].mxu1  ;;  %v2122_v60 = vpop.f32.mrb[33].mxu0 }
 0x194   : > { %1001 = vst [vmem:[%s2879_s5 + $0xb8] sm:$0xff] %v983_v56  ;;  %v2123_v62 = vadd.f32 %v2122_v60, %v2121_v58  ;;  %v2186_v0 = vpop.f32.mrb[33].mxu1  ;;  %v2124_v1 = vpop.f32.mrb[34].mxu0 }
 0x195   : > { %v2187_v2 = vadd.f32 %v2186_v0, %v2185_v59  ;;  %v2188_v3 = vpop.f32.mrb[34].mxu1  ;;  %v2125_v4 = vpop.f32.mrb[35].mxu0 }
 0x196   : > { %v1326_v5 = vadd.f32 %v2123_v62, %v2874_v57  ;;  %v2126_v6 = vadd.f32 %v2125_v4, %v2124_v1  ;;  %v2189_v8 = vpop.f32.mrb[35].mxu1 }
 0x197   : > { %v2190_v9 = vadd.f32 %v2189_v8, %v2188_v3 }
 0x198   : > { %v1423_v10 = vadd.f32 %v2187_v2, %v1326_v5  ;;  %v1329_v11 = vadd.f32 %v2126_v6, %v2874_v57 }
 0x19a   : > { %1954 = vst [vmem:[%s2879_s5 + $0x40] sm:$0xff] %v1423_v10  ;;  %v1426_v12 = vadd.f32 %v2190_v9, %v1329_v11  ;;  %v2127_v13 = vpop.f32.mrb[36].mxu0 }
 0x19b   : > { %v2191_v14 = vpop.f32.mrb[36].mxu1  ;;  %v2128_v15 = vpop.f32.mrb[37].mxu0 }
 0x19c   : > { %1955 = vst [vmem:[%s2879_s5 + $0x48] sm:$0xff] %v1426_v12  ;;  %v2129_v17 = vadd.f32 %v2128_v15, %v2127_v13  ;;  %v2192_v18 = vpop.f32.mrb[37].mxu1  ;;  %v2130_v20 = vpop.f32.mrb[38].mxu0 }
 0x19d   : > { %v2193_v21 = vadd.f32 %v2192_v18, %v2191_v14  ;;  %v2194_v22 = vpop.f32.mrb[38].mxu1  ;;  %v2131_v23 = vpop.f32.mrb[39].mxu0 }
 0x19e   : > { %v1334_v24 = vadd.f32 %v2129_v17, %v2874_v57  ;;  %v2132_v25 = vadd.f32 %v2131_v23, %v2130_v20  ;;  %v2195_v26 = vpop.f32.mrb[39].mxu1 }
 0x19f   : > { %v2196_v27 = vadd.f32 %v2195_v26, %v2194_v22 }
 0x1a0   : > { %v1431_v28 = vadd.f32 %v2193_v21, %v1334_v24  ;;  %v1337_v29 = vadd.f32 %v2132_v25, %v2874_v57 }
 0x1a2   : > { %1956 = vst [vmem:[%s2879_s5 + $0x50] sm:$0xff] %v1431_v28  ;;  %v1434_v31 = vadd.f32 %v2196_v27, %v1337_v29  ;;  %v2133_v32 = vpop.f32.mrb[40].mxu0 }
 0x1a3   : > { %v2197_v34 = vpop.f32.mrb[40].mxu1  ;;  %v2134_v35 = vpop.f32.mrb[41].mxu0 }
 0x1a4   : > { %1957 = vst [vmem:[%s2879_s5 + $0x58] sm:$0xff] %v1434_v31  ;;  %v2135_v36 = vadd.f32 %v2134_v35, %v2133_v32  ;;  %v2198_v37 = vpop.f32.mrb[41].mxu1  ;;  %v2136_v38 = vpop.f32.mrb[42].mxu0 }
 0x1a5   : > { %v2199_v61 = vadd.f32 %v2198_v37, %v2197_v34  ;;  %v2200_v39 = vpop.f32.mrb[42].mxu1  ;;  %v2137_v40 = vpop.f32.mrb[43].mxu0 }
 0x1a6   : > { %v1342_v63 = vadd.f32 %v2135_v36, %v2874_v57  ;;  %v2138_v7 = vadd.f32 %v2137_v40, %v2136_v38  ;;  %v2201_v41 = vpop.f32.mrb[43].mxu1 }
 0x1a7   : > { %v2202_v42 = vadd.f32 %v2201_v41, %v2200_v39 }
 0x1a8   : > { %v1439_v16 = vadd.f32 %v2199_v61, %v1342_v63  ;;  %v1345_v19 = vadd.f32 %v2138_v7, %v2874_v57 }
 0x1aa   : > { %1958 = vst [vmem:[%s2879_s5 + $0x60] sm:$0xff] %v1439_v16  ;;  %v1442_v43 = vadd.f32 %v2202_v42, %v1345_v19  ;;  %v2139_v44 = vpop.f32.mrb[44].mxu0 }
 0x1ab   : > { %v2203_v30 = vpop.f32.mrb[44].mxu1  ;;  %v2140_v46 = vpop.f32.mrb[45].mxu0 }
 0x1ac   : > { %1959 = vst [vmem:[%s2879_s5 + $0x68] sm:$0xff] %v1442_v43  ;;  %v2141_v33 = vadd.f32 %v2140_v46, %v2139_v44  ;;  %v2204_v47 = vpop.f32.mrb[45].mxu1  ;;  %v2142_v49 = vpop.f32.mrb[46].mxu0 }
 0x1ad   : > { %v2205_v45 = vadd.f32 %v2204_v47, %v2203_v30  ;;  %v2206_v50 = vpop.f32.mrb[46].mxu1  ;;  %v2143_v48 = vpop.f32.mrb[47].mxu0 }
 0x1ae   : > { %v1350_v51 = vadd.f32 %v2141_v33, %v2874_v57  ;;  %v2144_v52 = vadd.f32 %v2143_v48, %v2142_v49  ;;  %v2207_v53 = vpop.f32.mrb[47].mxu1 }
 0x1af   : > { %v2208_v54 = vadd.f32 %v2207_v53, %v2206_v50 }
 0x1b0   : > { %v1447_v55 = vadd.f32 %v2205_v45, %v1350_v51  ;;  %v1353_v56 = vadd.f32 %v2144_v52, %v2874_v57 }
 0x1b2   : > { %1960 = vst [vmem:[%s2879_s5 + $0x70] sm:$0xff] %v1447_v55  ;;  %v1450_v58 = vadd.f32 %v2208_v54, %v1353_v56  ;;  %v2145_v59 = vpop.f32.mrb[48].mxu0 }
 0x1b3   : > { %v2209_v60 = vpop.f32.mrb[48].mxu1  ;;  %v2146_v62 = vpop.f32.mrb[49].mxu0 }
 0x1b4   : > { %1961 = vst [vmem:[%s2879_s5 + $0x78] sm:$0xff] %v1450_v58  ;;  %v2147_v0 = vadd.f32 %v2146_v62, %v2145_v59  ;;  %v2210_v1 = vpop.f32.mrb[49].mxu1  ;;  %v2148_v2 = vpop.f32.mrb[50].mxu0  ;;  %v1606_v62 = vld [vmem:[%s2879_s5 + $0x8] sm:$0xff] (%p2593_p11) }
 0x1b5   : > { %v2211_v3 = vadd.f32 %v2210_v1, %v2209_v60  ;;  %v2212_v4 = vpop.f32.mrb[50].mxu1  ;;  %v2149_v5 = vpop.f32.mrb[51].mxu0  ;;  %v1604_v60 = vld [vmem:[%s2879_s5] sm:$0xff] (%p2593_p11)  ;;  %1607 = vst [vmem:[%s2952_s25 + $0x8] sm:$0xff] (%p2593_p11), %v1606_v62 }
 0x1b6   : > { %v1358_v6 = vadd.f32 %v2147_v0, %v2874_v57  ;;  %v2150_v8 = vadd.f32 %v2149_v5, %v2148_v2  ;;  %v2213_v9 = vpop.f32.mrb[51].mxu1  ;;  %v1610_v0 = vld [vmem:[%s2879_s5 + $0x18] sm:$0xff] (%p2593_p11)  ;;  %v1612_v1 = vld [vmem:[%s2879_s5 + $0x20] sm:$0xff] (%p2593_p11)  ;;  %v1614_v2 = vld [vmem:[%s2879_s5 + $0x28] sm:$0xff] (%p2593_p11)  ;;  %1605 = vst [vmem:[%s2952_s25] sm:$0xff] (%p2593_p11), %v1604_v60 }
 0x1b7   : > { %v2214_v10 = vadd.f32 %v2213_v9, %v2212_v4  ;;  %1611 = vst [vmem:[%s2952_s25 + $0x18] sm:$0xff] (%p2593_p11), %v1610_v0  ;;  %1613 = vst [vmem:[%s2952_s25 + $0x20] sm:$0xff] (%p2593_p11), %v1612_v1  ;;  %v1618_v4 = vld [vmem:[%s2879_s5 + $0x38] sm:$0xff] (%p2593_p11)  ;;  %v1620_v5 = vld [vmem:[%s2879_s5 + $0x40] sm:$0xff] (%p2593_p11) }
 0x1b8   : > { %v1455_v11 = vadd.f32 %v2211_v3, %v1358_v6  ;;  %v1361_v12 = vadd.f32 %v2150_v8, %v2874_v57  ;;  %1615 = vst [vmem:[%s2952_s25 + $0x28] sm:$0xff] (%p2593_p11), %v1614_v2  ;;  %v1616_v3 = vld [vmem:[%s2879_s5 + $0x30] sm:$0xff] (%p2593_p11)  ;;  %1619 = vst [vmem:[%s2952_s25 + $0x38] sm:$0xff] (%p2593_p11), %v1618_v4  ;;  %v1622_v6 = vld [vmem:[%s2879_s5 + $0x48] sm:$0xff] (%p2593_p11) }
 0x1b9   : > { %1617 = vst [vmem:[%s2952_s25 + $0x30] sm:$0xff] (%p2593_p11), %v1616_v3  ;;  %1621 = vst [vmem:[%s2952_s25 + $0x40] sm:$0xff] (%p2593_p11), %v1620_v5  ;;  %v1624_v8 = vld [vmem:[%s2879_s5 + $0x50] sm:$0xff] (%p2593_p11)  ;;  %v1626_v9 = vld [vmem:[%s2879_s5 + $0x58] sm:$0xff] (%p2593_p11) }
 0x1ba   : > { %1962 = vst [vmem:[%s2879_s5 + $0xc0] sm:$0xff] %v1455_v11  ;;  %v1458_v13 = vadd.f32 %v2214_v10, %v1361_v12  ;;  %v2151_v14 = vpop.f32.mrb[52].mxu0  ;;  %1623 = vst [vmem:[%s2952_s25 + $0x48] sm:$0xff] (%p2593_p11), %v1622_v6  ;;  %v1628_v10 = vld [vmem:[%s2879_s5 + $0x60] sm:$0xff] (%p2593_p11)  ;;  %v1630_v11 = vld [vmem:[%s2879_s5 + $0x68] sm:$0xff] (%p2593_p11) }
 0x1bb   : > { %v2215_v15 = vpop.f32.mrb[52].mxu1  ;;  %v2152_v17 = vpop.f32.mrb[53].mxu0  ;;  %1625 = vst [vmem:[%s2952_s25 + $0x50] sm:$0xff] (%p2593_p11), %v1624_v8  ;;  %1627 = vst [vmem:[%s2952_s25 + $0x58] sm:$0xff] (%p2593_p11), %v1626_v9  ;;  %v1632_v12 = vld [vmem:[%s2879_s5 + $0x70] sm:$0xff] (%p2593_p11) }
 0x1bc   : > { %1963 = vst [vmem:[%s2879_s5 + $0xc8] sm:$0xff] %v1458_v13  ;;  %v2153_v18 = vadd.f32 %v2152_v17, %v2151_v14  ;;  %v2216_v20 = vpop.f32.mrb[53].mxu1  ;;  %v2154_v21 = vpop.f32.mrb[54].mxu0  ;;  %1629 = vst [vmem:[%s2952_s25 + $0x60] sm:$0xff] (%p2593_p11), %v1628_v10  ;;  %v1634_v13 = vld [vmem:[%s2879_s5 + $0x78] sm:$0xff] (%p2593_p11)  ;;  %v1636_v14 = vld [vmem:[%s2879_s5 + $0x80] sm:$0xff] (%p2593_p11) }
 0x1bd   : > { %v2217_v22 = vadd.f32 %v2216_v20, %v2215_v15  ;;  %v2218_v23 = vpop.f32.mrb[54].mxu1  ;;  %v2155_v24 = vpop.f32.mrb[55].mxu0  ;;  %1631 = vst [vmem:[%s2952_s25 + $0x68] sm:$0xff] (%p2593_p11), %v1630_v11  ;;  %1633 = vst [vmem:[%s2952_s25 + $0x70] sm:$0xff] (%p2593_p11), %v1632_v12  ;;  %v1638_v15 = vld [vmem:[%s2879_s5 + $0x88] sm:$0xff] (%p2593_p11)  ;;  %v1640_v17 = vld [vmem:[%s2879_s5 + $0x90] sm:$0xff] (%p2593_p11) }
 0x1be   : > { %v1366_v25 = vadd.f32 %v2153_v18, %v2874_v57  ;;  %v2156_v26 = vadd.f32 %v2155_v24, %v2154_v21  ;;  %v2219_v27 = vpop.f32.mrb[55].mxu1  ;;  %1635 = vst [vmem:[%s2952_s25 + $0x78] sm:$0xff] (%p2593_p11), %v1634_v13  ;;  %1637 = vst [vmem:[%s2952_s25 + $0x100] sm:$0xff] (%p2593_p11), %v1636_v14  ;;  %v1642_v18 = vld [vmem:[%s2879_s5 + $0x98] sm:$0xff] (%p2593_p11)  ;;  %v1644_v20 = vld [vmem:[%s2879_s5 + $0xa0] sm:$0xff] (%p2593_p11) }
 0x1bf   : > { %v2220_v28 = vadd.f32 %v2219_v27, %v2218_v23  ;;  %1639 = vst [vmem:[%s2952_s25 + $0x108] sm:$0xff] (%p2593_p11), %v1638_v15  ;;  %1641 = vst [vmem:[%s2952_s25 + $0x110] sm:$0xff] (%p2593_p11), %v1640_v17  ;;  %v1646_v21 = vld [vmem:[%s2879_s5 + $0xa8] sm:$0xff] (%p2593_p11)  ;;  %v1650_v23 = vld [vmem:[%s2879_s5 + $0xb8] sm:$0xff] (%p2593_p11) }
 0x1c0   : > { %v1463_v29 = vadd.f32 %v2217_v22, %v1366_v25  ;;  %v1369_v31 = vadd.f32 %v2156_v26, %v2874_v57  ;;  %1643 = vst [vmem:[%s2952_s25 + $0x118] sm:$0xff] (%p2593_p11), %v1642_v18  ;;  %1645 = vst [vmem:[%s2952_s25 + $0x120] sm:$0xff] (%p2593_p11), %v1644_v20  ;;  %v1648_v22 = vld [vmem:[%s2879_s5 + $0xb0] sm:$0xff] (%p2593_p11) }
 0x1c1   : > { %1647 = vst [vmem:[%s2952_s25 + $0x128] sm:$0xff] (%p2593_p11), %v1646_v21  ;;  %1649 = vst [vmem:[%s2952_s25 + $0x130] sm:$0xff] (%p2593_p11), %v1648_v22  ;;  %v1652_v24 = vld [vmem:[%s2879_s5 + $0xc0] sm:$0xff] (%p2593_p11) }
 0x1c2   : > { %1964 = vst [vmem:[%s2879_s5 + $0xd0] sm:$0xff] %v1463_v29  ;;  %v1466_v32 = vadd.f32 %v2220_v28, %v1369_v31  ;;  %v2157_v34 = vpop.f32.mrb[56].mxu0  ;;  %1651 = vst [vmem:[%s2952_s25 + $0x138] sm:$0xff] (%p2593_p11), %v1650_v23 }
 0x1c3   : > { %v2221_v35 = vpop.f32.mrb[56].mxu1  ;;  %v2158_v36 = vpop.f32.mrb[57].mxu0  ;;  %v1654_v25 = vld [vmem:[%s2879_s5 + $0xc8] sm:$0xff] (%p2593_p11)  ;;  %1653 = vst [vmem:[%s2952_s25 + $0x140] sm:$0xff] (%p2593_p11), %v1652_v24 }
 0x1c4   : > { %1965 = vst [vmem:[%s2879_s5 + $0xd8] sm:$0xff] %v1466_v32  ;;  %v2159_v37 = vadd.f32 %v2158_v36, %v2157_v34  ;;  %v2222_v38 = vpop.f32.mrb[57].mxu1  ;;  %v2160_v61 = vpop.f32.mrb[58].mxu0  ;;  %1655 = vst [vmem:[%s2952_s25 + $0x148] sm:$0xff] (%p2593_p11), %v1654_v25 }
 0x1c5   : > { %v2223_v39 = vadd.f32 %v2222_v38, %v2221_v35  ;;  %v2224_v40 = vpop.f32.mrb[58].mxu1  ;;  %v2161_v63 = vpop.f32.mrb[59].mxu0 }
 0x1c6   : > { %v1374_v7 = vadd.f32 %v2159_v37, %v2874_v57  ;;  %v2162_v41 = vadd.f32 %v2161_v63, %v2160_v61  ;;  %v2225_v42 = vpop.f32.mrb[59].mxu1 }
 0x1c7   : > { %v2226_v16 = vadd.f32 %v2225_v42, %v2224_v40 }
 0x1c8   : > { %v1471_v19 = vadd.f32 %v2223_v39, %v1374_v7  ;;  %v1377_v43 = vadd.f32 %v2162_v41, %v2874_v57 }
 0x1c9   : > { %v1656_v26 = vld [vmem:[%s2879_s5 + $0xd0] sm:$0xff] (%p2593_p11) }
 0x1ca   : > { %1966 = vst [vmem:[%s2879_s5 + $0xe0] sm:$0xff] %v1471_v19  ;;  %v1474_v44 = vadd.f32 %v2226_v16, %v1377_v43  ;;  %v2163_v30 = vpop.f32.mrb[60].mxu0  ;;  %1657 = vst [vmem:[%s2952_s25 + $0x150] sm:$0xff] (%p2593_p11), %v1656_v26 }
 0x1cb   : > { %v2227_v46 = vpop.f32.mrb[60].mxu1  ;;  %v2164_v33 = vpop.f32.mrb[61].mxu0  ;;  %v1658_v27 = vld [vmem:[%s2879_s5 + $0xd8] sm:$0xff] (%p2593_p11) }
 0x1cc   : > { %1967 = vst [vmem:[%s2879_s5 + $0xe8] sm:$0xff] %v1474_v44  ;;  %v2165_v47 = vadd.f32 %v2164_v33, %v2163_v30  ;;  %v2228_v49 = vpop.f32.mrb[61].mxu1  ;;  %v2166_v45 = vpop.f32.mrb[62].mxu0  ;;  %1659 = vst [vmem:[%s2952_s25 + $0x158] sm:$0xff] (%p2593_p11), %v1658_v27 }
 0x1cd   : > { %v2229_v50 = vadd.f32 %v2228_v49, %v2227_v46  ;;  %v2230_v48 = vpop.f32.mrb[62].mxu1  ;;  %v2167_v51 = vpop.f32.mrb[63].mxu0 }
 0x1ce   : > { %v1382_v52 = vadd.f32 %v2165_v47, %v2874_v57  ;;  %v2168_v53 = vadd.f32 %v2167_v51, %v2166_v45  ;;  %v2231_v54 = vpop.f32.mrb[63].mxu1  ;;  %1508 = sbr.rel (!%p2593_p11) target bundleno = 477 (0x1dd), region = 44 }
 0x1cf   : > { %v2232_v55 = vadd.f32 %v2231_v54, %v2230_v48 }
 0x1d0   : > { %v1479_v56 = vadd.f32 %v2229_v50, %v1382_v52  ;;  %v1385_v58 = vadd.f32 %v2168_v53, %v2874_v57  ;;  %v1608_v57 = vld [vmem:[%s2879_s5 + $0x10] sm:$0xff] (%p2593_p11) }
 0x1d1   : > { %1609 = vst [vmem:[%s2952_s25 + $0x10] sm:$0xff] (%p2593_p11), %v1608_v57  ;;  %v1660_v28 = vld [vmem:[%s2879_s5 + $0xe0] sm:$0xff] (%p2593_p11) }
 0x1d2   : > { %1968 = vst [vmem:[%s2879_s5 + $0xf0] sm:$0xff] %v1479_v56  ;;  %v1482_v59 = vadd.f32 %v2232_v55, %v1385_v58  ;;  %1661 = vst [vmem:[%s2952_s25 + $0x160] sm:$0xff] (%p2593_p11), %v1660_v28 }
 0x1d3   : > { %v1662_v29 = vld [vmem:[%s2879_s5 + $0xe8] sm:$0xff] (%p2593_p11) }
 0x1d4   : > { %1969 = vst [vmem:[%s2879_s5 + $0xf8] sm:$0xff] %v1482_v59  ;;  %1663 = vst [vmem:[%s2952_s25 + $0x168] sm:$0xff] (%p2593_p11), %v1662_v29 }
 0x1d9   : > { %v1664_v31 = vld [vmem:[%s2879_s5 + $0xf0] sm:$0xff] }
 0x1da   : > { %1665 = vst [vmem:[%s2952_s25 + $0x170] sm:$0xff] %v1664_v31 }
 0x1db   : > { %v1666_v32 = vld [vmem:[%s2879_s5 + $0xf8] sm:$0xff] }
 0x1dc   : > { %1667 = vst [vmem:[%s2952_s25 + $0x178] sm:$0xff] %v1666_v32 }
 0x1dd PF: > { %s17_s17 = sadd.s32 1, %s2480_s17   ;;  %s3052_s12 = smov %s2464_s13 }
 0x1de   : > { %p14_p11 = scmp.ge.s32.totalorder %s17_s17, 4   ;;  %s3053_s13 = smov %s2468_s14 }
 0x1df   : > { %s3054_s14 = smov %s2602_s27  ;;  %s3055_s15 = smov %s2476_s16 }
 0x1e0   : > { %s3056_s16 = smov %s3058_s11  ;;  %16 = sbr.rel (!%p14_p11) target bundleno = 5 (0x5), region = 121 }
 0x1e7   :  { %1683 = vsyncpa [#allocation5], 1 }
 0x1e8   :  { %1685 = vsyncpa [#allocation5 + $0x1], 1 }
 0x1e9   :  { %1686 = vsyncpa [#allocation7], 1 }
 0x1ea   :  { %1688 = vsyncpa [#allocation7 + $0x1], 1 }

</bundles_post_ra>
